<compile_context>
chip_gen: v7x
topology: tpu7x:2x2x1
jax: 0.10.0
libtpu: 0.0.40
codegen_flags: <defaults>
</compile_context>

<pallas_src>
import numpy as np

import jax
import jax.numpy as jnp
from jax.experimental import pallas as pl
from jax.experimental.pallas import tpu as pltpu


def _mish(v):
    """Mish(x) = x*tanh(softplus(x)) = x*((1+e^x)^2 - 1)/((1+e^x)^2 + 1).

    One exp + one approx reciprocal on the EUP instead of exp+log+tanh.
    Clamping the exponent at 20 makes the result exactly x for large inputs
    (no inf/inf -> NaN) while being bit-harmless for |x| < 20.
    """
    t = 1.0 + jnp.exp(jnp.minimum(v, 20.0))
    s = t * t
    return v * (s - 1.0) * pl.reciprocal(s + 1.0, approx=True)


# ----------------------------------------------------------------------------
# The single fused kernel (one grid step == one batch sample)
# ----------------------------------------------------------------------------
def _make_kernel(hb, wb, cin, cout):
    c4 = 4 * cin                 # space-to-depth channel count
    wa = (wb + 2) * c4           # padded-row width, block-1 (s2d) activations
    wg = (wb + 2) * cout         # padded-row width, Cout activations

    def kernel(x_ref, se_w1_ref, se_w2_ref, se_b_ref, bn1_ref, bn_ref,
               w1_ref, w2_ref, w3_ref, w4_ref, out_ref, pad_a, pad_b):
        bf16 = jnp.bfloat16
        x = x_ref[0]                                           # (hb, wb*c4) lane-dense s2d

        # ---------------- SE module ----------------
        # Lane-group summation and 1/(H*W) are folded into se_w1 host-side;
        # only the sublane (row) sum happens here.
        pooled = jnp.sum(x, axis=0, keepdims=True)             # (1, wb*c4)
        seb = se_b_ref[...]
        hid = jnp.dot(pooled, se_w1_ref[...],
                      preferred_element_type=jnp.float32) + seb[0]
        hid = jnp.maximum(hid, 0.0)                            # ReLU
        gate = jnp.dot(hid, se_w2_ref[...],
                       preferred_element_type=jnp.float32) + seb[1]
        gate = 1.0 / (1.0 + jnp.exp(-gate))                    # sigmoid, (1, c4)
        gate_t = jnp.concatenate([gate] * wb, axis=1)          # (1, wb*c4) lane order

        # ---------------- block 1 pre-activation (SE gate folded into BN1 scale)
        h = _mish(x * (gate_t * bn1_ref[0:1, :]) + bn1_ref[1:2, :])   # (hb, wb*c4)

        # Padded scratch, flattened to (row, (wb+2)*C).  Interior rows are
        # written full-width (left/right border included via the zero concat);
        # only the border rows are re-zeroed -- every step, because scratch is
        # per-core and not guaranteed initialized under a "parallel" grid.
        zc4 = jnp.zeros((hb, c4), jnp.float32)
        pad_a[0:1, :] = jnp.zeros((1, wa), jnp.float32)
        pad_a[1:hb + 1, :] = jnp.concatenate([zc4, h, zc4], axis=1)

        # conv1: 3x3 / stride-2 == ONE matmul over two K-packed row windows of
        # the space-to-depth layout (block-banded bf16 weight, packed host-side).
        lhs = jnp.concatenate([pad_a[0:hb, :], pad_a[1:hb + 1, :]], axis=1)
        acc = jnp.dot(lhs.astype(bf16), w1_ref[...],
                      preferred_element_type=jnp.float32)      # (hb, wb*cout)

        bn = bn_ref[...]                                       # (6, wb*cout)
        zco = jnp.zeros((hb, cout), jnp.float32)
        zrow = jnp.zeros((1, wg), jnp.float32)
        pad_b[0:1, :] = zrow
        pad_b[hb + 1:hb + 2, :] = zrow

        # conv2 of block 1, with the 1x1/stride-2 projection shortcut folded
        # in as extra K rows (its window is pad_a's center rows).
        g = _mish(acc * bn[0] + bn[1])
        pad_b[1:hb + 1, :] = jnp.concatenate([zco, g, zco], axis=1)
        lhs = jnp.concatenate([pad_b[0:hb, :], pad_b[1:hb + 1, :],
                               pad_b[2:hb + 2, :], pad_a[1:hb + 1, :]], axis=1)
        y1 = jnp.dot(lhs.astype(bf16), w2_ref[...],
                     preferred_element_type=jnp.float32)       # block-1 output

        # ---------------- block 2 (stride 1, identity shortcut) ----------------
        g = _mish(y1 * bn[2] + bn[3])
        pad_b[1:hb + 1, :] = jnp.concatenate([zco, g, zco], axis=1)
        lhs = jnp.concatenate([pad_b[0:hb, :], pad_b[1:hb + 1, :],
                               pad_b[2:hb + 2, :]], axis=1)
        acc = jnp.dot(lhs.astype(bf16), w3_ref[...],
                      preferred_element_type=jnp.float32)

        g = _mish(acc * bn[4] + bn[5])
        pad_b[1:hb + 1, :] = jnp.concatenate([zco, g, zco], axis=1)
        lhs = jnp.concatenate([pad_b[0:hb, :], pad_b[1:hb + 1, :],
                               pad_b[2:hb + 2, :]], axis=1)
        acc = jnp.dot(lhs.astype(bf16), w4_ref[...],
                      preferred_element_type=jnp.float32)

        # post_drop has p=0.0 -> identity.  Lane-dense (hb, wb*cout) store.
        out_ref[0] = y1 + acc

    return kernel


def _encoder_call(x_s2d, packed, hb, wb, cin, cout):
    n = x_s2d.shape[0]
    c4 = 4 * cin

    def full(a):  # whole-array block, constant index map (DMA'd once)
        return pl.BlockSpec(a.shape, lambda b, nd=a.ndim: (0,) * nd)

    return pl.pallas_call(
        _make_kernel(hb, wb, cin, cout),
        out_shape=jax.ShapeDtypeStruct((n, hb, wb * cout), jnp.float32),
        grid=(n,),
        in_specs=[pl.BlockSpec((1, hb, wb * c4), lambda b: (b, 0, 0))]
                 + [full(a) for a in packed],
        out_specs=pl.BlockSpec((1, hb, wb * cout), lambda b: (b, 0, 0)),
        scratch_shapes=[
            pltpu.VMEM((hb + 1, (wb + 2) * c4), jnp.float32),    # padded s2d rows
            pltpu.VMEM((hb + 2, (wb + 2) * cout), jnp.float32),  # padded Cout rows
        ],
        compiler_params=pltpu.CompilerParams(
            dimension_semantics=("parallel",)),                  # v7x: 2 TCs
    )(x_s2d, *packed)


@jax.jit
def unet_encoder_block_forward(packed, x_nchw):
    """x_nchw: (N, Cin, H, W) -> (N, Cout, H/2, W/2)."""
    n, cin, h, w = x_nchw.shape
    hb, wb = h // 2, w // 2
    cout = packed[4].shape[1] // wb                 # bn slab is (6, wb*cout)
    # Space-to-depth (2x2 -> channels), channels-last, lane = (col, s2d-chan).
    # TODO(synk): producers/consumers that already use NHWC (or this layout)
    # can drop these two XLA transposes and read the lane-dense kernel output.
    x = jnp.transpose(x_nchw.astype(jnp.float32), (0, 2, 3, 1))
    x = x.reshape(n, hb, 2, wb, 2, cin)
    x = jnp.transpose(x, (0, 1, 3, 2, 4, 5)).reshape(n, hb, wb * 4 * cin)
    out = _encoder_call(x, packed, hb, wb, cin, cout)
    return jnp.transpose(out.reshape(n, hb, wb, cout), (0, 3, 1, 2))


# ----------------------------------------------------------------------------
# Host-side parameter folding / packing (numpy)
# ----------------------------------------------------------------------------
_S2D_TAP = {0: (0, 1), 1: (1, 0), 2: (1, 1)}   # full-res tap d -> (row-window offset, parity)


def _fold_bn(p, i, eps=1e-5):
    g = np.asarray(p[f"bn{i}_gamma"], np.float32)
    b = np.asarray(p[f"bn{i}_beta"], np.float32)
    m = np.asarray(p[f"bn{i}_mean"], np.float32)
    v = np.asarray(p[f"bn{i}_var"], np.float32)
    s = g / np.sqrt(v + eps)
    return s, b - m * s


def _conv3x3_rowmat(w_oihw, wb, di):
    """3x3/stride-1 conv, row window di -> block-banded ((wb+2)*Cin, wb*Cout)."""
    w = np.asarray(w_oihw, np.float32)
    co, ci = w.shape[0], w.shape[1]
    mat = np.zeros(((wb + 2) * ci, wb * co), np.float32)
    for j in range(wb):
        for dj in range(3):
            jj = j + dj
            mat[jj * ci:(jj + 1) * ci, j * co:(j + 1) * co] += w[:, :, di, dj].T
    return mat


def _stride2_rowmat(w_oihw, cin, wb, oi):
    """3x3/stride-2 conv on the s2d layout, row window oi in {0,1}
    -> block-banded ((wb+2)*4*Cin, wb*Cout)."""
    w = np.asarray(w_oihw, np.float32)
    co = w.shape[0]
    c4 = 4 * cin
    mat = np.zeros(((wb + 2) * c4, wb * co), np.float32)
    for di in range(3):
        o_r, p_r = _S2D_TAP[di]
        if o_r != oi:
            continue
        for dj in range(3):
            o_c, p_c = _S2D_TAP[dj]
            blk = (p_r * 2 + p_c) * cin
            for j in range(wb):
                jj = j + o_c
                mat[jj * c4 + blk:jj * c4 + blk + cin,
                    j * co:(j + 1) * co] += w[:, :, di, dj].T
    return mat


def _shortcut_rowmat(wsc_oihw, cin, wb):
    """1x1/stride-2 projection shortcut on the s2d layout (pad_a center rows)
    -> extra-K rows ((wb+2)*4*Cin, wb*Cout) for block-1's second matmul."""
    wsc = np.asarray(wsc_oihw, np.float32)[:, :, 0, 0]          # (Cout, Cin)
    co = wsc.shape[0]
    c4 = 4 * cin
    mat = np.zeros(((wb + 2) * c4, wb * co), np.float32)
    for j in range(wb):
        jj = j + 1
        mat[jj * c4:jj * c4 + cin, j * co:(j + 1) * co] = wsc.T
    return mat


def pack_kernel_params(p, cin, h, w):
    """Fold BN / SE pooling into weights, tile per-channel params to the
    lane-dense layouts, and pack every conv into a single block-banded
    (K, wb*Cout) bf16 matrix.  Returns the 9 arrays the kernel expects."""
    f32 = lambda a: np.asarray(a, np.float32)
    hb, wb = h // 2, w // 2
    c4 = 4 * cin
    cr = f32(p["se_w1"]).shape[1]

    # SE: mean-pool folded into w1 (explicit H*W, no square-input assumption);
    # hidden dim zero-padded to c4 so the kernel never sees the tiny cr axis.
    se_w1 = np.zeros((wb * c4, c4), np.float32)
    se_w1[:, :cr] = np.tile(f32(p["se_w1"]), (4 * wb, 1)) / float(h * w)
    se_w2 = np.zeros((c4, c4), np.float32)
    se_w2[:cr, :] = np.tile(f32(p["se_w2"]), (1, 4))
    se_b = np.zeros((2, c4), np.float32)
    se_b[0, :cr] = f32(p["se_b1"])
    se_b[1, :] = np.tile(f32(p["se_b2"]), 4)

    # Folded BN affine params, tiled to the lane-dense activation layouts.
    s1, b1 = _fold_bn(p, 1)
    bn1 = np.stack([np.tile(s1, 4 * wb), np.tile(b1, 4 * wb)])           # (2, wb*4*cin)
    rows = []
    for i in (2, 3, 4):
        s, b = _fold_bn(p, i)
        rows += [np.tile(s, wb), np.tile(b, wb)]
    bn = np.stack(rows)                                                   # (6, wb*cout)

    # Conv weights -> one block-banded row-matmul matrix per conv (bf16).
    w1 = np.concatenate([_stride2_rowmat(p["conv1_w"], cin, wb, oi)
                         for oi in (0, 1)], axis=0)
    w2 = np.concatenate([_conv3x3_rowmat(p["conv2_w"], wb, di) for di in range(3)]
                        + [_shortcut_rowmat(p["sc_w"], cin, wb)], axis=0)
    w3 = np.concatenate([_conv3x3_rowmat(p["conv3_w"], wb, di) for di in range(3)], axis=0)
    w4 = np.concatenate([_conv3x3_rowmat(p["conv4_w"], wb, di) for di in range(3)], axis=0)

    return (tuple(jnp.asarray(a) for a in (se_w1, se_w2, se_b, bn1, bn))
            + tuple(jnp.asarray(a, jnp.bfloat16) for a in (w1, w2, w3, w4)))


def build_params(key, cin=8, cout=16, se_reduction=4):
    cr = max(cin // se_reduction, 1)
    ks = jax.random.split(key, 16)

    def kaiming(k, co, ci, kh, kw):
        fan_out = co * kh * kw
        return jax.random.normal(k, (co, ci, kh, kw), jnp.float32) * np.sqrt(2.0 / fan_out)

    p = {
        "se_w1": jax.random.normal(ks[0], (cin, cr), jnp.float32) / np.sqrt(cin),
        "se_b1": 0.1 * jax.random.normal(ks[1], (cr,), jnp.float32),
        "se_w2": jax.random.normal(ks[2], (cr, cin), jnp.float32) / np.sqrt(cr),
        "se_b2": 0.1 * jax.random.normal(ks[3], (cin,), jnp.float32),
        "conv1_w": kaiming(ks[4], cout, cin, 3, 3),     # block1 conv1, stride 2
        "sc_w":    kaiming(ks[5], cout, cin, 1, 1),     # block1 projection shortcut
        "conv2_w": kaiming(ks[6], cout, cout, 3, 3),    # block1 conv2
        "conv3_w": kaiming(ks[7], cout, cout, 3, 3),    # block2 conv1
        "conv4_w": kaiming(ks[8], cout, cout, 3, 3),    # block2 conv2
    }
    # BatchNorm2d affine / running stats (eval mode); randomized so the BN
    # folding is actually exercised by the reference check.
    chans = {1: cin, 2: cout, 3: cout, 4: cout}
    for i, c in chans.items():
        kk = jax.random.split(ks[8 + i], 4)
        p[f"bn{i}_gamma"] = 1.0 + 0.1 * jax.random.normal(kk[0], (c,), jnp.float32)
        p[f"bn{i}_beta"] = 0.1 * jax.random.normal(kk[1], (c,), jnp.float32)
        p[f"bn{i}_mean"] = 0.1 * jax.random.normal(kk[2], (c,), jnp.float32)
        p[f"bn{i}_var"] = jax.random.uniform(kk[3], (c,), jnp.float32, 0.5, 1.5)
    return p


# ----------------------------------------------------------------------------
# Pure-JAX reference (independent formulation, used only to validate)
# ----------------------------------------------------------------------------
def reference_forward(p, x):
    def mish(v):
        return v * jnp.tanh(jax.nn.softplus(v))

    def bn(v, i, eps=1e-5):
        s = p[f"bn{i}_gamma"] / jnp.sqrt(p[f"bn{i}_var"] + eps)
        b = p[f"bn{i}_beta"] - p[f"bn{i}_mean"] * s
        return v * s[None, :, None, None] + b[None, :, None, None]

    def conv(v, w, stride, pad):
        return jax.lax.conv_general_dilated(
            v, w, (stride, stride), ((pad, pad), (pad, pad)),
            dimension_numbers=("NCHW", "OIHW", "NCHW"))

    # SE
    s = jnp.mean(x, axis=(2, 3))
    s = jax.nn.relu(s @ p["se_w1"] + p["se_b1"])
    s = jax.nn.sigmoid(s @ p["se_w2"] + p["se_b2"])
    out = x * s[:, :, None, None]
    # PreActBlock(Cin, Cout, stride=2)
    h = mish(bn(out, 1))
    sc = conv(h, p["sc_w"], 2, 0)
    out = conv(h, p["conv1_w"], 2, 1)
    out = conv(mish(bn(out, 2)), p["conv2_w"], 1, 1)
    out = out + sc
    # PreActBlock(Cout, Cout, stride=1)
    h = mish(bn(out, 3))
    o = conv(h, p["conv3_w"], 1, 1)
    o = conv(mish(bn(o, 4)), p["conv4_w"], 1, 1)
    return out + o          # Dropout(p=0.0) is an exact identity


if __name__ == "__main__":
    CIN, COUT, H, W, N = 8, 16, 16, 16, 2
    key = jax.random.PRNGKey(0)
    pkey, xkey = jax.random.split(key)

    params = build_params(pkey, CIN, COUT)
    packed = pack_kernel_params(params, CIN, H, W)
    x = jax.random.uniform(xkey, (N, CIN, H, W), jnp.float32)

    out = jax.block_until_ready(unet_encoder_block_forward(packed, x))
    assert out.shape == (N, COUT, H // 2, W // 2), out.shape
    assert out.dtype == jnp.float32

    ref = jax.block_until_ready(reference_forward(params, x))
    max_err = float(jnp.max(jnp.abs(out - ref)))
    assert max_err < 5e-2, f"kernel/reference mismatch: max|diff|={max_err}"
    print("KERNEL_OK")
</pallas_src>

<mosaic_0001>
module attributes {stable_mosaic.version = 11 : i64} {
  func.func @kernel(%arg0: i32, %arg1: memref<1x8x256xf32, #tpu.memory_space<vmem>>, %arg2: memref<256x32xf32, #tpu.memory_space<vmem>>, %arg3: memref<32x32xf32, #tpu.memory_space<vmem>>, %arg4: memref<2x32xf32, #tpu.memory_space<vmem>>, %arg5: memref<2x256xf32, #tpu.memory_space<vmem>>, %arg6: memref<6x128xf32, #tpu.memory_space<vmem>>, %arg7: memref<640x128xbf16, #tpu.memory_space<vmem>>, %arg8: memref<800x128xbf16, #tpu.memory_space<vmem>>, %arg9: memref<480x128xbf16, #tpu.memory_space<vmem>>, %arg10: memref<480x128xbf16, #tpu.memory_space<vmem>>, %arg11: memref<1x8x128xf32, #tpu.memory_space<vmem>>, %arg12: memref<9x320xf32, #tpu.memory_space<vmem>>, %arg13: memref<10x160xf32, #tpu.memory_space<vmem>>) attributes {dimension_semantics = [#tpu.dimension_semantics<parallel>], iteration_bounds = array<i64: 2>, scalar_prefetch = 0 : i64, scratch_operands = 2 : i64, tpu.core_type = #tpu.core_type<tc>, window_params = [{transform_indices = @transform_0, window_bounds = array<i64: 1, 8, 256>}, {pipeline_mode = #tpu.pipeline_mode<synchronous>, transform_indices = @transform_1, window_bounds = array<i64: 256, 32>}, {pipeline_mode = #tpu.pipeline_mode<synchronous>, transform_indices = @transform_2, window_bounds = array<i64: 32, 32>}, {pipeline_mode = #tpu.pipeline_mode<synchronous>, transform_indices = @transform_3, window_bounds = array<i64: 2, 32>}, {pipeline_mode = #tpu.pipeline_mode<synchronous>, transform_indices = @transform_4, window_bounds = array<i64: 2, 256>}, {pipeline_mode = #tpu.pipeline_mode<synchronous>, transform_indices = @transform_5, window_bounds = array<i64: 6, 128>}, {pipeline_mode = #tpu.pipeline_mode<synchronous>, transform_indices = @transform_6, window_bounds = array<i64: 640, 128>}, {pipeline_mode = #tpu.pipeline_mode<synchronous>, transform_indices = @transform_7, window_bounds = array<i64: 800, 128>}, {pipeline_mode = #tpu.pipeline_mode<synchronous>, transform_indices = @transform_8, window_bounds = array<i64: 480, 128>}, {pipeline_mode = #tpu.pipeline_mode<synchronous>, transform_indices = @transform_9, window_bounds = array<i64: 480, 128>}, {transform_indices = @transform_10, window_bounds = array<i64: 1, 8, 128>}]} {
    %c0 = arith.constant 0 : index
    %c0_0 = arith.constant 0 : index
    %c0_1 = arith.constant 0 : index
    %0 = vector.load %arg1[%c0, %c0_0, %c0_1] : memref<1x8x256xf32, #tpu.memory_space<vmem>>, vector<1x8x256xf32>
    %1 = vector.shape_cast %0 : vector<1x8x256xf32> to vector<8x256xf32>
    %cst = arith.constant dense<0.000000e+00> : vector<256xf32>
    %2 = vector.multi_reduction <add>, %1, %cst [0] : vector<8x256xf32> to vector<256xf32>
    %3 = vector.shape_cast %2 : vector<256xf32> to vector<1x256xf32>
    %c0_2 = arith.constant 0 : index
    %c0_3 = arith.constant 0 : index
    %4 = vector.load %arg4[%c0_2, %c0_3] : memref<2x32xf32, #tpu.memory_space<vmem>>, vector<2x32xf32>
    %c0_4 = arith.constant 0 : index
    %c0_5 = arith.constant 0 : index
    %5 = vector.load %arg2[%c0_4, %c0_5] : memref<256x32xf32, #tpu.memory_space<vmem>>, vector<256x32xf32>
    %cst_6 = arith.constant dense<0.000000e+00> : vector<1x32xf32>
    %6 = tpu.matmul %3, %5, %cst_6 {dimension_numbers = #tpu.dot_dimension_numbers<[1], [0], [0], [1], [0, 0, 1, 1], [], []>} : vector<1x256xf32>, vector<256x32xf32>, vector<1x32xf32> -> vector<1x32xf32>
    %7 = vector.extract_strided_slice %4 {offsets = [0, 0], sizes = [1, 32], strides = [1, 1]} : vector<2x32xf32> to vector<1x32xf32>
    %8 = vector.shape_cast %7 : vector<1x32xf32> to vector<32xf32>
    %9 = vector.shape_cast %8 : vector<32xf32> to vector<1x32xf32>
    %10 = arith.addf %6, %9 : vector<1x32xf32>
    %cst_7 = arith.constant 0.000000e+00 : f32
    %11 = vector.broadcast %cst_7 : f32 to vector<1x32xf32>
    %12 = arith.maximumf %10, %11 : vector<1x32xf32>
    %c0_8 = arith.constant 0 : index
    %c0_9 = arith.constant 0 : index
    %13 = vector.load %arg3[%c0_8, %c0_9] : memref<32x32xf32, #tpu.memory_space<vmem>>, vector<32x32xf32>
    %cst_10 = arith.constant dense<0.000000e+00> : vector<1x32xf32>
    %14 = tpu.matmul %12, %13, %cst_10 {dimension_numbers = #tpu.dot_dimension_numbers<[1], [0], [0], [1], [0, 0, 1, 1], [], []>} : vector<1x32xf32>, vector<32x32xf32>, vector<1x32xf32> -> vector<1x32xf32>
    %15 = vector.extract_strided_slice %4 {offsets = [1, 0], sizes = [1, 32], strides = [1, 1]} : vector<2x32xf32> to vector<1x32xf32>
    %16 = vector.shape_cast %15 : vector<1x32xf32> to vector<32xf32>
    %17 = vector.shape_cast %16 : vector<32xf32> to vector<1x32xf32>
    %18 = arith.addf %14, %17 : vector<1x32xf32>
    %cst_11 = arith.constant 0.000000e+00 : f32
    %19 = vector.broadcast %cst_11 : f32 to vector<1x32xf32>
    %20 = arith.subf %19, %18 : vector<1x32xf32>
    %21 = math.exp %20 : vector<1x32xf32>
    %cst_12 = arith.constant 1.000000e+00 : f32
    %22 = vector.broadcast %cst_12 : f32 to vector<1x32xf32>
    %23 = arith.addf %22, %21 : vector<1x32xf32>
    %cst_13 = arith.constant 1.000000e+00 : f32
    %24 = vector.broadcast %cst_13 : f32 to vector<1x32xf32>
    %25 = arith.divf %24, %23 : vector<1x32xf32>
    %26 = tpu.concatenate %25, %25, %25, %25, %25, %25, %25, %25 in 1 : vector<1x32xf32>, vector<1x32xf32>, vector<1x32xf32>, vector<1x32xf32>, vector<1x32xf32>, vector<1x32xf32>, vector<1x32xf32>, vector<1x32xf32> -> vector<1x256xf32>
    %c0_14 = arith.constant 0 : index
    %c0_15 = arith.constant 0 : index
    %27 = vector.load %arg5[%c0_14, %c0_15] : memref<2x256xf32, #tpu.memory_space<vmem>>, vector<1x256xf32>
    %28 = arith.mulf %26, %27 : vector<1x256xf32>
    %29 = vector.broadcast %28 : vector<1x256xf32> to vector<8x256xf32>
    %30 = arith.mulf %1, %29 : vector<8x256xf32>
    %c1 = arith.constant 1 : index
    %c0_16 = arith.constant 0 : index
    %31 = vector.load %arg5[%c1, %c0_16] : memref<2x256xf32, #tpu.memory_space<vmem>>, vector<1x256xf32>
    %32 = vector.broadcast %31 : vector<1x256xf32> to vector<8x256xf32>
    %33 = arith.addf %30, %32 : vector<8x256xf32>
    %cst_17 = arith.constant 2.000000e+01 : f32
    %34 = vector.broadcast %cst_17 : f32 to vector<8x256xf32>
    %35 = arith.minimumf %33, %34 : vector<8x256xf32>
    %36 = math.exp %35 : vector<8x256xf32>
    %cst_18 = arith.constant 1.000000e+00 : f32
    %37 = vector.broadcast %cst_18 : f32 to vector<8x256xf32>
    %38 = arith.addf %37, %36 : vector<8x256xf32>
    %39 = arith.mulf %38, %38 : vector<8x256xf32>
    %cst_19 = arith.constant 1.000000e+00 : f32
    %40 = vector.broadcast %cst_19 : f32 to vector<8x256xf32>
    %41 = arith.subf %39, %40 : vector<8x256xf32>
    %42 = arith.mulf %33, %41 : vector<8x256xf32>
    %cst_20 = arith.constant 1.000000e+00 : f32
    %43 = vector.broadcast %cst_20 : f32 to vector<8x256xf32>
    %44 = arith.addf %39, %43 : vector<8x256xf32>
    %45 = tpu.reciprocal %44 {approx = true} : vector<8x256xf32> -> vector<8x256xf32>
    %46 = arith.mulf %42, %45 : vector<8x256xf32>
    %cst_21 = arith.constant 0.000000e+00 : f32
    %47 = vector.broadcast %cst_21 : f32 to vector<8x32xf32>
    %cst_22 = arith.constant 0.000000e+00 : f32
    %48 = vector.broadcast %cst_22 : f32 to vector<1x320xf32>
    %c0_23 = arith.constant 0 : index
    %c0_24 = arith.constant 0 : index
    %49 = vector.load %arg12[%c0_23, %c0_24] : memref<9x320xf32, #tpu.memory_space<vmem>>, vector<1x320xf32>
    tpu.vector_store %arg12[%c0_23, %c0_24], %48 {strides = array<i32>} : memref<9x320xf32, #tpu.memory_space<vmem>>, vector<1x320xf32>,
    %50 = tpu.concatenate %47, %46, %47 in 1 : vector<8x32xf32>, vector<8x256xf32>, vector<8x32xf32> -> vector<8x320xf32>
    %c1_25 = arith.constant 1 : index
    %c0_26 = arith.constant 0 : index
    %51 = vector.load %arg12[%c1_25, %c0_26] : memref<9x320xf32, #tpu.memory_space<vmem>>, vector<8x320xf32>
    tpu.vector_store %arg12[%c1_25, %c0_26], %50 {strides = array<i32>} : memref<9x320xf32, #tpu.memory_space<vmem>>, vector<8x320xf32>,
    %c0_27 = arith.constant 0 : index
    %c0_28 = arith.constant 0 : index
    %52 = vector.load %arg12[%c0_27, %c0_28] : memref<9x320xf32, #tpu.memory_space<vmem>>, vector<8x320xf32>
    %c1_29 = arith.constant 1 : index
    %c0_30 = arith.constant 0 : index
    %53 = vector.load %arg12[%c1_29, %c0_30] : memref<9x320xf32, #tpu.memory_space<vmem>>, vector<8x320xf32>
    %54 = tpu.concatenate %52, %53 in 1 : vector<8x320xf32>, vector<8x320xf32> -> vector<8x640xf32>
    %55 = arith.truncf %54 : vector<8x640xf32> to vector<8x640xbf16>
    %c0_31 = arith.constant 0 : index
    %c0_32 = arith.constant 0 : index
    %56 = vector.load %arg7[%c0_31, %c0_32] : memref<640x128xbf16, #tpu.memory_space<vmem>>, vector<640x128xbf16>
    %cst_33 = arith.constant dense<0.000000e+00> : vector<8x128xf32>
    %57 = tpu.matmul %55, %56, %cst_33 {dimension_numbers = #tpu.dot_dimension_numbers<[1], [0], [0], [1], [0, 0, 1, 1], [], []>} : vector<8x640xbf16>, vector<640x128xbf16>, vector<8x128xf32> -> vector<8x128xf32>
    %c0_34 = arith.constant 0 : index
    %c0_35 = arith.constant 0 : index
    %58 = vector.load %arg6[%c0_34, %c0_35] : memref<6x128xf32, #tpu.memory_space<vmem>>, vector<6x128xf32>
    %cst_36 = arith.constant 0.000000e+00 : f32
    %59 = vector.broadcast %cst_36 : f32 to vector<8x16xf32>
    %cst_37 = arith.constant 0.000000e+00 : f32
    %60 = vector.broadcast %cst_37 : f32 to vector<1x160xf32>
    %c0_38 = arith.constant 0 : index
    %c0_39 = arith.constant 0 : index
    %61 = vector.load %arg13[%c0_38, %c0_39] : memref<10x160xf32, #tpu.memory_space<vmem>>, vector<1x160xf32>
    tpu.vector_store %arg13[%c0_38, %c0_39], %60 {strides = array<i32>} : memref<10x160xf32, #tpu.memory_space<vmem>>, vector<1x160xf32>,
    %c9 = arith.constant 9 : index
    %c0_40 = arith.constant 0 : index
    %62 = vector.load %arg13[%c9, %c0_40] : memref<10x160xf32, #tpu.memory_space<vmem>>, vector<1x160xf32>
    tpu.vector_store %arg13[%c9, %c0_40], %60 {strides = array<i32>} : memref<10x160xf32, #tpu.memory_space<vmem>>, vector<1x160xf32>,
    %63 = vector.extract_strided_slice %58 {offsets = [0, 0], sizes = [1, 128], strides = [1, 1]} : vector<6x128xf32> to vector<1x128xf32>
    %64 = vector.shape_cast %63 : vector<1x128xf32> to vector<128xf32>
    %65 = vector.shape_cast %64 : vector<128xf32> to vector<1x128xf32>
    %66 = vector.broadcast %65 : vector<1x128xf32> to vector<8x128xf32>
    %67 = arith.mulf %57, %66 : vector<8x128xf32>
    %68 = vector.extract_strided_slice %58 {offsets = [1, 0], sizes = [1, 128], strides = [1, 1]} : vector<6x128xf32> to vector<1x128xf32>
    %69 = vector.shape_cast %68 : vector<1x128xf32> to vector<128xf32>
    %70 = vector.shape_cast %69 : vector<128xf32> to vector<1x128xf32>
    %71 = vector.broadcast %70 : vector<1x128xf32> to vector<8x128xf32>
    %72 = arith.addf %67, %71 : vector<8x128xf32>
    %cst_41 = arith.constant 2.000000e+01 : f32
    %73 = vector.broadcast %cst_41 : f32 to vector<8x128xf32>
    %74 = arith.minimumf %72, %73 : vector<8x128xf32>
    %75 = math.exp %74 : vector<8x128xf32>
    %cst_42 = arith.constant 1.000000e+00 : f32
    %76 = vector.broadcast %cst_42 : f32 to vector<8x128xf32>
    %77 = arith.addf %76, %75 : vector<8x128xf32>
    %78 = arith.mulf %77, %77 : vector<8x128xf32>
    %cst_43 = arith.constant 1.000000e+00 : f32
    %79 = vector.broadcast %cst_43 : f32 to vector<8x128xf32>
    %80 = arith.subf %78, %79 : vector<8x128xf32>
    %81 = arith.mulf %72, %80 : vector<8x128xf32>
    %cst_44 = arith.constant 1.000000e+00 : f32
    %82 = vector.broadcast %cst_44 : f32 to vector<8x128xf32>
    %83 = arith.addf %78, %82 : vector<8x128xf32>
    %84 = tpu.reciprocal %83 {approx = true} : vector<8x128xf32> -> vector<8x128xf32>
    %85 = arith.mulf %81, %84 : vector<8x128xf32>
    %86 = tpu.concatenate %59, %85, %59 in 1 : vector<8x16xf32>, vector<8x128xf32>, vector<8x16xf32> -> vector<8x160xf32>
    %c1_45 = arith.constant 1 : index
    %c0_46 = arith.constant 0 : index
    %87 = vector.load %arg13[%c1_45, %c0_46] : memref<10x160xf32, #tpu.memory_space<vmem>>, vector<8x160xf32>
    tpu.vector_store %arg13[%c1_45, %c0_46], %86 {strides = array<i32>} : memref<10x160xf32, #tpu.memory_space<vmem>>, vector<8x160xf32>,
    %c0_47 = arith.constant 0 : index
    %c0_48 = arith.constant 0 : index
    %88 = vector.load %arg13[%c0_47, %c0_48] : memref<10x160xf32, #tpu.memory_space<vmem>>, vector<8x160xf32>
    %c1_49 = arith.constant 1 : index
    %c0_50 = arith.constant 0 : index
    %89 = vector.load %arg13[%c1_49, %c0_50] : memref<10x160xf32, #tpu.memory_space<vmem>>, vector<8x160xf32>
    %c2 = arith.constant 2 : index
    %c0_51 = arith.constant 0 : index
    %90 = vector.load %arg13[%c2, %c0_51] : memref<10x160xf32, #tpu.memory_space<vmem>>, vector<8x160xf32>
    %c1_52 = arith.constant 1 : index
    %c0_53 = arith.constant 0 : index
    %91 = vector.load %arg12[%c1_52, %c0_53] : memref<9x320xf32, #tpu.memory_space<vmem>>, vector<8x320xf32>
    %92 = tpu.concatenate %88, %89, %90, %91 in 1 : vector<8x160xf32>, vector<8x160xf32>, vector<8x160xf32>, vector<8x320xf32> -> vector<8x800xf32>
    %93 = arith.truncf %92 : vector<8x800xf32> to vector<8x800xbf16>
    %c0_54 = arith.constant 0 : index
    %c0_55 = arith.constant 0 : index
    %94 = vector.load %arg8[%c0_54, %c0_55] : memref<800x128xbf16, #tpu.memory_space<vmem>>, vector<800x128xbf16>
    %cst_56 = arith.constant dense<0.000000e+00> : vector<8x128xf32>
    %95 = tpu.matmul %93, %94, %cst_56 {dimension_numbers = #tpu.dot_dimension_numbers<[1], [0], [0], [1], [0, 0, 1, 1], [], []>} : vector<8x800xbf16>, vector<800x128xbf16>, vector<8x128xf32> -> vector<8x128xf32>
    %96 = vector.extract_strided_slice %58 {offsets = [2, 0], sizes = [1, 128], strides = [1, 1]} : vector<6x128xf32> to vector<1x128xf32>
    %97 = vector.shape_cast %96 : vector<1x128xf32> to vector<128xf32>
    %98 = vector.shape_cast %97 : vector<128xf32> to vector<1x128xf32>
    %99 = vector.broadcast %98 : vector<1x128xf32> to vector<8x128xf32>
    %100 = arith.mulf %95, %99 : vector<8x128xf32>
    %101 = vector.extract_strided_slice %58 {offsets = [3, 0], sizes = [1, 128], strides = [1, 1]} : vector<6x128xf32> to vector<1x128xf32>
    %102 = vector.shape_cast %101 : vector<1x128xf32> to vector<128xf32>
    %103 = vector.shape_cast %102 : vector<128xf32> to vector<1x128xf32>
    %104 = vector.broadcast %103 : vector<1x128xf32> to vector<8x128xf32>
    %105 = arith.addf %100, %104 : vector<8x128xf32>
    %cst_57 = arith.constant 2.000000e+01 : f32
    %106 = vector.broadcast %cst_57 : f32 to vector<8x128xf32>
    %107 = arith.minimumf %105, %106 : vector<8x128xf32>
    %108 = math.exp %107 : vector<8x128xf32>
    %cst_58 = arith.constant 1.000000e+00 : f32
    %109 = vector.broadcast %cst_58 : f32 to vector<8x128xf32>
    %110 = arith.addf %109, %108 : vector<8x128xf32>
    %111 = arith.mulf %110, %110 : vector<8x128xf32>
    %cst_59 = arith.constant 1.000000e+00 : f32
    %112 = vector.broadcast %cst_59 : f32 to vector<8x128xf32>
    %113 = arith.subf %111, %112 : vector<8x128xf32>
    %114 = arith.mulf %105, %113 : vector<8x128xf32>
    %cst_60 = arith.constant 1.000000e+00 : f32
    %115 = vector.broadcast %cst_60 : f32 to vector<8x128xf32>
    %116 = arith.addf %111, %115 : vector<8x128xf32>
    %117 = tpu.reciprocal %116 {approx = true} : vector<8x128xf32> -> vector<8x128xf32>
    %118 = arith.mulf %114, %117 : vector<8x128xf32>
    %119 = tpu.concatenate %59, %118, %59 in 1 : vector<8x16xf32>, vector<8x128xf32>, vector<8x16xf32> -> vector<8x160xf32>
    %c1_61 = arith.constant 1 : index
    %c0_62 = arith.constant 0 : index
    %120 = vector.load %arg13[%c1_61, %c0_62] : memref<10x160xf32, #tpu.memory_space<vmem>>, vector<8x160xf32>
    tpu.vector_store %arg13[%c1_61, %c0_62], %119 {strides = array<i32>} : memref<10x160xf32, #tpu.memory_space<vmem>>, vector<8x160xf32>,
    %c0_63 = arith.constant 0 : index
    %c0_64 = arith.constant 0 : index
    %121 = vector.load %arg13[%c0_63, %c0_64] : memref<10x160xf32, #tpu.memory_space<vmem>>, vector<8x160xf32>
    %c1_65 = arith.constant 1 : index
    %c0_66 = arith.constant 0 : index
    %122 = vector.load %arg13[%c1_65, %c0_66] : memref<10x160xf32, #tpu.memory_space<vmem>>, vector<8x160xf32>
    %c2_67 = arith.constant 2 : index
    %c0_68 = arith.constant 0 : index
    %123 = vector.load %arg13[%c2_67, %c0_68] : memref<10x160xf32, #tpu.memory_space<vmem>>, vector<8x160xf32>
    %124 = tpu.concatenate %121, %122, %123 in 1 : vector<8x160xf32>, vector<8x160xf32>, vector<8x160xf32> -> vector<8x480xf32>
    %125 = arith.truncf %124 : vector<8x480xf32> to vector<8x480xbf16>
    %c0_69 = arith.constant 0 : index
    %c0_70 = arith.constant 0 : index
    %126 = vector.load %arg9[%c0_69, %c0_70] : memref<480x128xbf16, #tpu.memory_space<vmem>>, vector<480x128xbf16>
    %cst_71 = arith.constant dense<0.000000e+00> : vector<8x128xf32>
    %127 = tpu.matmul %125, %126, %cst_71 {dimension_numbers = #tpu.dot_dimension_numbers<[1], [0], [0], [1], [0, 0, 1, 1], [], []>} : vector<8x480xbf16>, vector<480x128xbf16>, vector<8x128xf32> -> vector<8x128xf32>
    %128 = vector.extract_strided_slice %58 {offsets = [4, 0], sizes = [1, 128], strides = [1, 1]} : vector<6x128xf32> to vector<1x128xf32>
    %129 = vector.shape_cast %128 : vector<1x128xf32> to vector<128xf32>
    %130 = vector.shape_cast %129 : vector<128xf32> to vector<1x128xf32>
    %131 = vector.broadcast %130 : vector<1x128xf32> to vector<8x128xf32>
    %132 = arith.mulf %127, %131 : vector<8x128xf32>
    %133 = vector.extract_strided_slice %58 {offsets = [5, 0], sizes = [1, 128], strides = [1, 1]} : vector<6x128xf32> to vector<1x128xf32>
    %134 = vector.shape_cast %133 : vector<1x128xf32> to vector<128xf32>
    %135 = vector.shape_cast %134 : vector<128xf32> to vector<1x128xf32>
    %136 = vector.broadcast %135 : vector<1x128xf32> to vector<8x128xf32>
    %137 = arith.addf %132, %136 : vector<8x128xf32>
    %cst_72 = arith.constant 2.000000e+01 : f32
    %138 = vector.broadcast %cst_72 : f32 to vector<8x128xf32>
    %139 = arith.minimumf %137, %138 : vector<8x128xf32>
    %140 = math.exp %139 : vector<8x128xf32>
    %cst_73 = arith.constant 1.000000e+00 : f32
    %141 = vector.broadcast %cst_73 : f32 to vector<8x128xf32>
    %142 = arith.addf %141, %140 : vector<8x128xf32>
    %143 = arith.mulf %142, %142 : vector<8x128xf32>
    %cst_74 = arith.constant 1.000000e+00 : f32
    %144 = vector.broadcast %cst_74 : f32 to vector<8x128xf32>
    %145 = arith.subf %143, %144 : vector<8x128xf32>
    %146 = arith.mulf %137, %145 : vector<8x128xf32>
    %cst_75 = arith.constant 1.000000e+00 : f32
    %147 = vector.broadcast %cst_75 : f32 to vector<8x128xf32>
    %148 = arith.addf %143, %147 : vector<8x128xf32>
    %149 = tpu.reciprocal %148 {approx = true} : vector<8x128xf32> -> vector<8x128xf32>
    %150 = arith.mulf %146, %149 : vector<8x128xf32>
    %151 = tpu.concatenate %59, %150, %59 in 1 : vector<8x16xf32>, vector<8x128xf32>, vector<8x16xf32> -> vector<8x160xf32>
    %c1_76 = arith.constant 1 : index
    %c0_77 = arith.constant 0 : index
    %152 = vector.load %arg13[%c1_76, %c0_77] : memref<10x160xf32, #tpu.memory_space<vmem>>, vector<8x160xf32>
    tpu.vector_store %arg13[%c1_76, %c0_77], %151 {strides = array<i32>} : memref<10x160xf32, #tpu.memory_space<vmem>>, vector<8x160xf32>,
    %c0_78 = arith.constant 0 : index
    %c0_79 = arith.constant 0 : index
    %153 = vector.load %arg13[%c0_78, %c0_79] : memref<10x160xf32, #tpu.memory_space<vmem>>, vector<8x160xf32>
    %c1_80 = arith.constant 1 : index
    %c0_81 = arith.constant 0 : index
    %154 = vector.load %arg13[%c1_80, %c0_81] : memref<10x160xf32, #tpu.memory_space<vmem>>, vector<8x160xf32>
    %c2_82 = arith.constant 2 : index
    %c0_83 = arith.constant 0 : index
    %155 = vector.load %arg13[%c2_82, %c0_83] : memref<10x160xf32, #tpu.memory_space<vmem>>, vector<8x160xf32>
    %156 = tpu.concatenate %153, %154, %155 in 1 : vector<8x160xf32>, vector<8x160xf32>, vector<8x160xf32> -> vector<8x480xf32>
    %157 = arith.truncf %156 : vector<8x480xf32> to vector<8x480xbf16>
    %c0_84 = arith.constant 0 : index
    %c0_85 = arith.constant 0 : index
    %158 = vector.load %arg10[%c0_84, %c0_85] : memref<480x128xbf16, #tpu.memory_space<vmem>>, vector<480x128xbf16>
    %cst_86 = arith.constant dense<0.000000e+00> : vector<8x128xf32>
    %159 = tpu.matmul %157, %158, %cst_86 {dimension_numbers = #tpu.dot_dimension_numbers<[1], [0], [0], [1], [0, 0, 1, 1], [], []>} : vector<8x480xbf16>, vector<480x128xbf16>, vector<8x128xf32> -> vector<8x128xf32>
    %160 = arith.addf %95, %159 : vector<8x128xf32>
    %c0_87 = arith.constant 0 : index
    %c0_88 = arith.constant 0 : index
    %c0_89 = arith.constant 0 : index
    %161 = vector.load %arg11[%c0_87, %c0_88, %c0_89] : memref<1x8x128xf32, #tpu.memory_space<vmem>>, vector<1x8x128xf32>
    %162 = vector.shape_cast %161 : vector<1x8x128xf32> to vector<8x128xf32>
    %163 = vector.shape_cast %160 : vector<8x128xf32> to vector<1x8x128xf32>
    tpu.vector_store %arg11[%c0_87, %c0_88, %c0_89], %163 {strides = array<i32>} : memref<1x8x128xf32, #tpu.memory_space<vmem>>, vector<1x8x128xf32>,
    return
  }
  func.func @transform_0(%arg0: i32) -> (i32, i32, i32) {
    %c0_i32 = arith.constant 0 : i32
    %c0_i32_0 = arith.constant 0 : i32
    %c0_i32_1 = arith.constant 0 : i32
    return %arg0, %c0_i32, %c0_i32_0 : i32, i32, i32
  }
  func.func @transform_1(%arg0: i32) -> (i32, i32) {
    %c0_i32 = arith.constant 0 : i32
    %c0_i32_0 = arith.constant 0 : i32
    %c0_i32_1 = arith.constant 0 : i32
    return %c0_i32, %c0_i32_0 : i32, i32
  }
  func.func @transform_2(%arg0: i32) -> (i32, i32) {
    %c0_i32 = arith.constant 0 : i32
    %c0_i32_0 = arith.constant 0 : i32
    %c0_i32_1 = arith.constant 0 : i32
    return %c0_i32, %c0_i32_0 : i32, i32
  }
  func.func @transform_3(%arg0: i32) -> (i32, i32) {
    %c0_i32 = arith.constant 0 : i32
    %c0_i32_0 = arith.constant 0 : i32
    %c0_i32_1 = arith.constant 0 : i32
    return %c0_i32, %c0_i32_0 : i32, i32
  }
  func.func @transform_4(%arg0: i32) -> (i32, i32) {
    %c0_i32 = arith.constant 0 : i32
    %c0_i32_0 = arith.constant 0 : i32
    %c0_i32_1 = arith.constant 0 : i32
    return %c0_i32, %c0_i32_0 : i32, i32
  }
  func.func @transform_5(%arg0: i32) -> (i32, i32) {
    %c0_i32 = arith.constant 0 : i32
    %c0_i32_0 = arith.constant 0 : i32
    %c0_i32_1 = arith.constant 0 : i32
    return %c0_i32, %c0_i32_0 : i32, i32
  }
  func.func @transform_6(%arg0: i32) -> (i32, i32) {
    %c0_i32 = arith.constant 0 : i32
    %c0_i32_0 = arith.constant 0 : i32
    %c0_i32_1 = arith.constant 0 : i32
    return %c0_i32, %c0_i32_0 : i32, i32
  }
  func.func @transform_7(%arg0: i32) -> (i32, i32) {
    %c0_i32 = arith.constant 0 : i32
    %c0_i32_0 = arith.constant 0 : i32
    %c0_i32_1 = arith.constant 0 : i32
    return %c0_i32, %c0_i32_0 : i32, i32
  }
  func.func @transform_8(%arg0: i32) -> (i32, i32) {
    %c0_i32 = arith.constant 0 : i32
    %c0_i32_0 = arith.constant 0 : i32
    %c0_i32_1 = arith.constant 0 : i32
    return %c0_i32, %c0_i32_0 : i32, i32
  }
  func.func @transform_9(%arg0: i32) -> (i32, i32) {
    %c0_i32 = arith.constant 0 : i32
    %c0_i32_0 = arith.constant 0 : i32
    %c0_i32_1 = arith.constant 0 : i32
    return %c0_i32, %c0_i32_0 : i32, i32
  }
  func.func @transform_10(%arg0: i32) -> (i32, i32, i32) {
    %c0_i32 = arith.constant 0 : i32
    %c0_i32_0 = arith.constant 0 : i32
    %c0_i32_1 = arith.constant 0 : i32
    return %arg0, %c0_i32, %c0_i32_0 : i32, i32, i32
  }
}

</mosaic_0001>

<bundles_post_ra>
// kernel: unet_encoder_block_forward.1
= control target key start
LH: loop header
LB: loop body
LE: loop exit
PB: predicated region body
PF: predicated region fallthrough
CT: control target
= control target key end

     0   :  { %s3469_s13 = smov 0   ;;  %s4230_s0 = inlined_call_operand.vmem [shape: f32[2,8,256], index: 0, kind: input, shape index: {}]   ;;  %s4231_s1 = inlined_call_operand.vmem [shape: f32[256,32], index: 1, kind: input, shape index: {}]   ;;  %s4232_s2 = inlined_call_operand.vmem [shape: f32[32,32], index: 2, kind: input, shape index: {}]   ;;  %s4233_s3 = inlined_call_operand.vmem [shape: f32[2,32], index: 3, kind: input, shape index: {}]   ;;  %s4234_s4 = inlined_call_operand.vmem [shape: f32[2,256], index: 4, kind: input, shape index: {}]   ;;  %s4235_s5 = inlined_call_operand.vmem [shape: f32[6,128], index: 5, kind: input, shape index: {}]   ;;  %s4236_s6 = inlined_call_operand.vmem [shape: bf16[640,128], index: 6, kind: input, shape index: {}]   ;;  %s4237_s7 = inlined_call_operand.vmem [shape: bf16[800,128], index: 7, kind: input, shape index: {}]   ;;  %s4238_s8 = inlined_call_operand.vmem [shape: bf16[480,128], index: 8, kind: input, shape index: {}]   ;;  %s4239_s9 = inlined_call_operand.vmem [shape: bf16[480,128], index: 9, kind: input, shape index: {}]   ;;  %s4240_s10 = inlined_call_operand.vmem [shape: f32[2,8,128], index: 10, kind: output, shape index: {}]  }
   0x1 LB: > { %s2724_s14 = sadd.s32 4294967295, %s3404_s13   ;;  %p2728_p0 = scmp.ge.s32.totalorder %s3404_s13, 1  ;;  %s3404_s13 = sphi %s3469_s13, %s20_s13  }
   0x2   : > { %p312_p1 = scmp.lt.s32.totalorder %s3404_s13, 3 }
   0x4   : > { %p313_p2 = pnand %p2728_p0, %p312_p1 }
   0x5   : > { %v390_v0 = vld [vmem:[%s4231_s1 + $0x80] sm:$0xff] (!%p313_p2)  ;;  %v391_v1 = vld [vmem:[%s4231_s1 + $0x88] sm:$0xff] (!%p313_p2)  ;;  %p349_p3 = scmp.lt.s32.totalorder (!%p313_p2), %s2724_s14, 1  ;;  %v392_v5 = vld [vmem:[%s4231_s1 + $0x90] sm:$0xff] (!%p313_p2)  ;;  %vm3407_vm0 = vmmov (!%p313_p2), 0   ;;  %vm484_vm1 = vcmask (!%p313_p2), 261120  }
   0x6   : > { %316 = sbr.rel (%p313_p2) target bundleno = 2745 (0xab9), region = 60  ;;  %v374_v2 = vld [vmem:[%s4231_s1] sm:$0xff] (!%p313_p2)  ;;  %v3140_v3 = vpack.c.bf16 (!%p313_p2), %v391_v1, %v390_v0  ;;  %v375_v4 = vld [vmem:[%s4231_s1 + $0x8] sm:$0xff] (!%p313_p2)  ;;  %v393_v6 = vld [vmem:[%s4231_s1 + $0x98] sm:$0xff] (!%p313_p2)  ;;  %v3406_v1 = vmov (!%p313_p2), 0.0|0.0   ;;  %s3409_s21 = smov (!%p313_p2), 96  }
   0x7   : > { %v3142_v7 = vpack.c.bf16 (!%p313_p2), %v375_v4, %v374_v2  ;;  %v3144_v8 = vpack.c.bf16 (!%p313_p2), %v393_v6, %v392_v5  ;;  %v376_v9 = vld [vmem:[%s4231_s1 + $0x10] sm:$0xff] (!%p313_p2)  ;;  %v377_v10 = vld [vmem:[%s4231_s1 + $0x18] sm:$0xff] (!%p313_p2)  ;;  %v394_v11 = vld [vmem:[%s4231_s1 + $0xa0] sm:$0xff] (!%p313_p2)  ;;  %3172 = vmatprep.subr.bf16.mxu1 (!%p313_p2), %v3406_v1  ;;  %v3408_v5 = vmov (!%p313_p2), 0.0   ;;  %s3410_s22 = smov (!%p313_p2), 32   ;;  %s3411_s23 = smov (!%p313_p2), 64  }
   0x8   : > { %3141 = vmatprep.subr.bf16.mxu0 (!%p313_p2), %v3140_v3  ;;  %v395_v12 = vld [vmem:[%s4231_s1 + $0xa8] sm:$0xff] (!%p313_p2)  ;;  %v3146_v13 = vpack.c.bf16 (!%p313_p2), %v377_v10, %v376_v9  ;;  %v378_v15 = vld [vmem:[%s4231_s1 + $0x20] sm:$0xff] (!%p313_p2)  ;;  %v396_v17 = vld [vmem:[%s4231_s1 + $0xb0] sm:$0xff] (!%p313_p2)  ;;  %3109 = vmatprep.mubr.msk.f32.mxu1 (!%p313_p2), %vm3407_vm0, %v3408_v5  ;;  %vm575_vm3 = vcmask (!%p313_p2), 523264   ;;  %vm577_vm4 = vcmask (!%p313_p2), 785408   ;;  %vm665_vm6 = vcmask (!%p313_p2), 523265  }
   0x9   : > { %3143 = vmatpush3.bf16.msra.mxu0 (!%p313_p2), %v3142_v7  ;;  %v3148_v14 = vpack.c.bf16 (!%p313_p2), %v395_v12, %v394_v11  ;;  %v379_v16 = vld [vmem:[%s4231_s1 + $0x28] sm:$0xff] (!%p313_p2)  ;;  %v397_v18 = vld [vmem:[%s4231_s1 + $0xb8] sm:$0xff] (!%p313_p2)  ;;  %v380_v21 = vld [vmem:[%s4231_s1 + $0x30] sm:$0xff] (!%p313_p2)  ;;  %vm669_vm7 = vcmask (!%p313_p2), 516096   ;;  %vm686_vm8 = vcmask (!%p313_p2), 1046528   ;;  %s3412_s18 = smov (!%p313_p2), 16  }
   0xa   : > { %3145 = vmatprep.subr.bf16.mxu0 (!%p313_p2), %v3144_v8  ;;  %v3150_v19 = vpack.c.bf16 (!%p313_p2), %v379_v16, %v378_v15  ;;  %v3152_v20 = vpack.c.bf16 (!%p313_p2), %v397_v18, %v396_v17  ;;  %v381_v22 = vld [vmem:[%s4231_s1 + $0x38] sm:$0xff] (!%p313_p2)  ;;  %v398_v23 = vld [vmem:[%s4231_s1 + $0xc0] sm:$0xff] (!%p313_p2)  ;;  %v399_v24 = vld [vmem:[%s4231_s1 + $0xc8] sm:$0xff] (!%p313_p2)  ;;  %vm1185_vm9 = vcmask (!%p313_p2), 130048   ;;  %vm1195_vm10 = vcmask (!%p313_p2), 261121  }
   0xb   : > { %v382_v26 = vld [vmem:[%s4231_s1 + $0x40] sm:$0xff] (!%p313_p2)  ;;  %v383_v27 = vld [vmem:[%s4231_s1 + $0x48] sm:$0xff] (!%p313_p2)  ;;  %v3154_v30 = vpack.c.bf16 (!%p313_p2), %v381_v22, %v380_v21  ;;  %v400_v31 = vld [vmem:[%s4231_s1 + $0xd0] sm:$0xff] (!%p313_p2)  ;;  %v3156_v34 = vpack.c.bf16 (!%p313_p2), %v399_v24, %v398_v23  ;;  %vm1198_vm11 = vcmask (!%p313_p2), 253952   ;;  %vm1237_vm12 = vcmask (!%p313_p2), 1045504  }
   0xc   : > { %v401_v32 = vld [vmem:[%s4231_s1 + $0xd8] sm:$0xff] (!%p313_p2)  ;;  %v384_v37 = vld [vmem:[%s4231_s1 + $0x50] sm:$0xff] (!%p313_p2)  ;;  %v3158_v40 = vpack.c.bf16 (!%p313_p2), %v383_v27, %v382_v26  ;;  %v402_v41 = vld [vmem:[%s4231_s1 + $0xe0] sm:$0xff] (!%p313_p2) }
   0xd   : > { %s4242_s14 = smov (!%p349_p3, %s2724_s14), 1  ;;  %3147 = vmatpush3.bf16.msra.mxu0 %v3146_v13  ;;  %v385_v38 = vld [vmem:[%s4231_s1 + $0x58] sm:$0xff]  ;;  %v403_v42 = vld [vmem:[%s4231_s1 + $0xe8] sm:$0xff]  ;;  %v3160_v44 = vpack.c.bf16 %v401_v32, %v400_v31  ;;  %v386_v47 = vld [vmem:[%s4231_s1 + $0x60] sm:$0xff] }
   0xe   : > { %s2894_s17 = sshll.u32 %s4242_s14, 4  ;;  %3149 = vmatprep.subr.bf16.mxu0 %v3148_v14  ;;  %v387_v48 = vld [vmem:[%s4231_s1 + $0x68] sm:$0xff]  ;;  %v3162_v49 = vpack.c.bf16 %v385_v38, %v384_v37  ;;  %v404_v50 = vld [vmem:[%s4231_s1 + $0xf0] sm:$0xff]  ;;  %v405_v51 = vld [vmem:[%s4231_s1 + $0xf8] sm:$0xff]  ;;  %v3164_v54 = vpack.c.bf16 %v403_v42, %v402_v41 }
   0xf   : > { %s353_s28 = scalar_lea.vmem %s4230_s0, %s2894_s17  ;;  %v388_v56 = vld [vmem:[%s4231_s1 + $0x70] sm:$0xff]  ;;  %v389_v57 = vld [vmem:[%s4231_s1 + $0x78] sm:$0xff]  ;;  %v3166_v58 = vpack.c.bf16 %v387_v48, %v386_v47  ;;  %v3168_v59 = vpack.c.bf16 %v405_v51, %v404_v50  ;;  %v477_v62 = vld [vmem:[%s4232_s2] sm:$0xff] }
  0x10   : > { %v3537_v25 = vld [vmem:[%s353_s28] sm:$0xff]  ;;  %v3545_v28 = vld [vmem:[%s353_s28 + $0x8] sm:$0xff]  ;;  %v3170_v60 = vpack.c.bf16 %v389_v57, %v388_v56  ;;  %v479_v2 = vld [vmem:[%s4232_s2 + $0x10] sm:$0xff] }
  0x11   : > { %v361_v29 = vrot.slane %v3537_v25, 4  ;;  %3151 = vmatpush3.bf16.msra.mxu0 %v3150_v19  ;;  %v367_v33 = vrot.slane %v3545_v28, 4  ;;  %v478_v63 = vld [vmem:[%s4232_s2 + $0x8] sm:$0xff]  ;;  %v480_v3 = vld [vmem:[%s4232_s2 + $0x18] sm:$0xff]  ;;  %v373_v7 = vld [vmem:[%s4233_s3] sm:$0x3]  ;;  %v581_v19 = vlaneseq }
  0x12   : > { %3153 = vmatprep.subr.bf16.mxu0 %v3152_v20  ;;  %v3173_v0 = vpack.c.bf16 %v478_v63, %v477_v62  ;;  %v3176_v4 = vpack.c.bf16 %v480_v3, %v479_v2  ;;  %v482_v12 = vrot.slane %v373_v7, 1  ;;  %v3224_v22 = vld [vmem:[%s4236_s6 + $0x40] sm:$0xff]   ;;  %v3226_v24 = vld [vmem:[%s4236_s6 + $0x48] sm:$0xff]   ;;  %v3228_v27 = vld [vmem:[%s4236_s6 + $0x50] sm:$0xff]  }
  0x13   : > { %v362_v35 = vadd.f32 %v361_v29, %v3537_v25  ;;  %v368_v36 = vadd.f32 %v367_v33, %v3545_v28  ;;  %vm1154_vm2 = vcmp.lt.s32.totalorder %v581_v19, 160  ;;  %v3225_v23 = vld [vmem:[%s4236_s6] sm:$0xff]   ;;  %v3227_v26 = vld [vmem:[%s4236_s6 + $0x8] sm:$0xff]   ;;  %v3229_v29 = vld [vmem:[%s4236_s6 + $0x10] sm:$0xff]   ;;  %vm640_vm5 = vcmp.lt.s32.totalorder %v581_v19, 320 }
  0x14   : > { %3174 = vmatpush3.bf16.msra.mxu1 %v3173_v0  ;;  %1159 = vst.msk [vmem:[#allocation3 + $0x11] ss:$8 sm:$0x3] %vm1154_vm2, %v3408_v5  ;;  %1156 = vst.msk [vmem:[#allocation3] ss:$8 sm:$0x3] %vm1154_vm2, %v3408_v5 }
  0x15   : > { %v363_v39 = vrot.slane %v362_v35, 2  ;;  %3155 = vmatpush3.bf16.msra.mxu0 %v3154_v30  ;;  %v369_v43 = vrot.slane %v368_v36, 2  ;;  %3175 = vmatprep.subr.bf16.mxu1 %v3406_v1  ;;  %v3230_v30 = vld [vmem:[%s4236_s6 + $0x58] sm:$0xff]   ;;  %v3232_v32 = vld [vmem:[%s4236_s6 + $0x60] sm:$0xff]  }
  0x16   : > { %3157 = vmatprep.subr.bf16.mxu0 %v3156_v34  ;;  %v3231_v31 = vld [vmem:[%s4236_s6 + $0x18] sm:$0xff]   ;;  %v3233_v33 = vld [vmem:[%s4236_s6 + $0x20] sm:$0xff]   ;;  %v3645_v34 = vshrl.u32 %v581_v19, 7  ;;  %642 = vst.msk [vmem:[#allocation2] ss:$8 sm:$0x7] %vm640_vm5, %v3408_v5 }
  0x17   : > { %v364_v45 = vadd.f32 %v363_v39, %v362_v35  ;;  %v370_v46 = vadd.f32 %v369_v43, %v368_v36  ;;  %v579_v38 = vld [vmem:[%s4234_s4] ss:$2 sm:$0x3] }
  0x18   : > { %3177 = vmatpush3.bf16.msra.mxu1 %v3176_v4  ;;  %v3648_v35 = vsub.s32 0, %v3645_v34  ;;  %v3651_v36 = vsub.s32 1, %v3645_v34  ;;  %v3241_v19 = vld [vmem:[%s4236_s6 + $0x100] sm:$0xff]  }
  0x19   : > { %3159 = vmatpush3.bf16.msra.mxu0 %v3158_v40  ;;  %v371_v52 = vrot.slane %v370_v46, 1  ;;  %v365_v53 = vrot.slane %v364_v45, 1  ;;  %3112 = vmatprep.subr.bf16.mxu1 %v3408_v5 }
  0x1a   : > { %3161 = vmatprep.subr.bf16.mxu0 %v3160_v44  ;;  %v584_v39 = vrot.slane %v579_v38, %v3648_v35  ;;  %v588_v40 = vrot.slane %v579_v38, %v3651_v36 }
  0x1b   : > { %v372_v55 = vadd.f32 %v371_v52, %v370_v46  ;;  %v366_v61 = vadd.f32 %v365_v53, %v364_v45  ;;  %v2733_v46 = vld [vmem:[%s4234_s4 + $0x1] ss:$2 sm:$0x3] }
  0x1c   : > { %v613_v51 = vrot.slane %v2733_v46, %v3651_v36  ;;  %v609_v52 = vrot.slane %v2733_v46, %v3648_v35 }
  0x1d   : > { %3163 = vmatpush3.bf16.msra.mxu0 %v3162_v49  ;;  %470 = vmatprep.mubr.f32.mxu0 %v372_v55 }
  0x1e   : > { %3165 = vmatprep.subr.bf16.mxu0 %v3164_v54 }
  0x21   : > { %3167 = vmatpush3.bf16.msra.mxu0 %v3166_v58 }
  0x22   : > { %3169 = vmatprep.subr.bf16.mxu0 %v3168_v59 }
  0x25   : > { %3171 = vmatpush3.bf16.msra.mxu0 %v3170_v60 }
  0x26   : > { %2935 = vmatprep.subr.bf16.mxu0 %v3224_v22  ;;  %v3250_v22 = vld [vmem:[%s4236_s6 + $0x118] sm:$0xff]  }
  0x28   : > { %471 = vmatmul.mubr.f32.vlgmr.msra.gmra.mrb[0].mxu0 %v366_v61 }
  0x29   : > { %2936 = vmatpush3.bf16.msra.mxu0 %v3225_v23  ;;  %v3253_v23 = vld [vmem:[%s4236_s6 + $0x120] sm:$0xff]  }
  0x2a   : > { %2937 = vmatprep.subr.bf16.mxu0 %v3226_v24  ;;  %v3256_v24 = vld [vmem:[%s4236_s6 + $0x128] sm:$0xff]  }
  0x2d   : > { %2938 = vmatpush3.bf16.msra.mxu0 %v3227_v26 }
  0x2e   : > { %2939 = vmatprep.subr.bf16.mxu0 %v3228_v27 }
  0x31   : > { %2940 = vmatpush3.bf16.msra.mxu0 %v3229_v29 }
  0x32   : > { %2941 = vmatprep.subr.bf16.mxu0 %v3230_v30  ;;  %v3259_v30 = vld [vmem:[%s4236_s6 + $0x130] sm:$0xff]  }
  0x35   : > { %2942 = vmatpush3.bf16.msra.mxu0 %v3231_v31 }
  0x36   : > { %2943 = vmatprep.subr.bf16.mxu0 %v3232_v32 }
  0x39   : > { %2944 = vmatpush3.bf16.msra.mxu0 %v3233_v33 }
  0xfb   : > { %v2927_v6 = vpop.f32.mrb[0].mxu0 }
  0xfc   : > { %v2928_v8 = vpop.f32.mrb[1].mxu0 }
  0xfd   : > { %v2929_v9 = vadd.f32 %v2928_v8, %v2927_v6  ;;  %v3236_v6 = vld [vmem:[%s4236_s6 + $0x70] sm:$0xff]  }
  0xff   : > { %v473_v10 = vadd.f32 %v2929_v9, %v373_v7  ;;  %v3237_v7 = vld [vmem:[%s4236_s6 + $0x30] sm:$0xff]   ;;  %v3238_v9 = vld [vmem:[%s4236_s6 + $0x78] sm:$0xff]  }
 0x101   : > { %v476_v11 = vmax.f32 %v473_v10, 0.0 }
 0x103   : > { %3110 = vmatmul.mubr.msk.f32.vlgmr.msra.gmra.mrb[0].mxu1 %vm484_vm1, %v476_v11  ;;  %v3239_v11 = vld [vmem:[%s4236_s6 + $0x38] sm:$0xff]  }
 0x104   : > { %3128 = vmatprep.mubr.msk.bf16.mxu1 %vm3407_vm0, %v3408_v5  ;;  %3113 = vmatpush3.bf16.msra.mxu1 %v3241_v19 }
 0x105   : > { %3114 = vmatprep.subr.bf16.mxu1 %v3408_v5 }
 0x1d6   : > { %v554_v13 = vpop.f32.mrb[0].mxu1 }
 0x1d7   : > { %v555_v14 = vadd.f32 %v554_v13, %v482_v12  ;;  %v3111_v15 = vpop.f32.mrb[1].mxu1 }
 0x1d9   : > { %v558_v16 = vsub.f32 0.0, %v555_v14 }
 0x1db   : > { %v559_v17 = vmul.f32 1.442695, %v558_v16 }
 0x1dd   : > { %3374 = vpow2.f32 %v559_v17 }
 0x1e7   : > { %v3375_v18 = vpop.eup %3374 }
 0x1e8   : > { %v561_v20 = vadd.f32 1.0, %v3375_v18  ;;  %v3240_v18 = vld [vmem:[%s4236_s6 + $0xc0] sm:$0xff]  }
 0x1ea   : > { %3376 = vrcp.f32 %v561_v20  ;;  %v3244_v20 = vld [vmem:[%s4236_s6 + $0x108] sm:$0xff]  }
 0x1eb   : > { %3115 = vmatpush3.bf16.msra.mxu1 %v3244_v20 }
 0x1ec   : > { %3116 = vmatprep.subr.bf16.mxu1 %v3408_v5 }
 0x1f4   : > { %v3377_v21 = vpop.eup %3376 }
 0x1f5   : > { %571 = vrot.lane.b32.xlu1 %v3377_v21, %s3409_s21  ;;  %565 = vrot.lane.b32.xlu0 %v3377_v21, %s3410_s22 }
 0x1f9   : > { %568 = vrot.lane.b32.xlu0 %v3377_v21, %s3411_s23 }
 0x267   : > { %v566_v37 = vpop.permute.xlu0 %565  ;;  %v572_v43 = vpop.permute.xlu1 %571 }
 0x268   : > { %v574_v41 = vsel %vm484_vm1, %v3377_v21, %v566_v37  ;;  %v3247_v21 = vld [vmem:[%s4236_s6 + $0x110] sm:$0xff]  }
 0x269   : > { %3117 = vmatpush3.bf16.msra.mxu1 %v3247_v21 }
 0x26a   : > { %3118 = vmatprep.subr.bf16.mxu1 %v3408_v5 }
 0x26b   : > { %v569_v42 = vpop.permute.xlu0 %568 }
 0x26c   : > { %v576_v44 = vsel %vm575_vm3, %v574_v41, %v569_v42  ;;  %v3242_v42 = vld [vmem:[%s4236_s6 + $0x80] sm:$0xff]  }
 0x26d   : > { %v578_v45 = vsel %vm577_vm4, %v576_v44, %v572_v43  ;;  %3119 = vmatpush3.bf16.msra.mxu1 %v3250_v22 }
 0x26e   : > { %v591_v47 = vmul.f32 %v584_v39, %v578_v45  ;;  %v592_v48 = vmul.f32 %v588_v40, %v578_v45  ;;  %3120 = vmatprep.subr.bf16.mxu1 %v3408_v5  ;;  %v3262_v39 = vld [vmem:[%s4236_s6 + $0x138] sm:$0xff]  }
 0x270   : > { %v596_v49 = vrot.slane %v591_v47, %v3648_v35  ;;  %v600_v50 = vrot.slane %v592_v48, %v3648_v35 }
 0x271   : > { %3121 = vmatpush3.bf16.msra.mxu1 %v3253_v23 }
 0x272   : > { %v601_v53 = vmul.f32 %v596_v49, %v3537_v25  ;;  %v602_v54 = vmul.f32 %v600_v50, %v3545_v28  ;;  %v3234_v25 = vld [vmem:[%s4236_s6 + $0x68] sm:$0xff]   ;;  %3122 = vmatprep.subr.bf16.mxu1 %v3408_v5 }
 0x273   : > { %v3235_v28 = vld [vmem:[%s4236_s6 + $0x28] sm:$0xff]   ;;  %2945 = vmatprep.subr.bf16.mxu0 %v3234_v25 }
 0x274   : > { %v617_v55 = vadd.f32 %v613_v51, %v602_v54  ;;  %v616_v56 = vadd.f32 %v609_v52, %v601_v53  ;;  %2946 = vmatpush3.bf16.msra.mxu0 %v3235_v28  ;;  %v3255_v25 = vld [vmem:[%s4236_s6 + $0xe8] sm:$0xff]  }
 0x275   : > { %2947 = vmatprep.subr.bf16.mxu0 %v3236_v6  ;;  %3123 = vmatpush3.bf16.msra.mxu1 %v3256_v24  ;;  %v3257_v28 = vld [vmem:[%s4236_s6 + $0xa8] sm:$0xff]   ;;  %v3258_v6 = vld [vmem:[%s4236_s6 + $0xf0] sm:$0xff]  }
 0x276   : > { %v619_v57 = vmin.f32 %v617_v55, 20.0  ;;  %v618_v58 = vmin.f32 %v616_v56, 20.0  ;;  %3124 = vmatprep.subr.bf16.mxu1 %v3408_v5 }
 0x278   : > { %v622_v59 = vmul.f32 1.442695, %v619_v57  ;;  %v620_v60 = vmul.f32 1.442695, %v618_v58  ;;  %2948 = vmatpush3.bf16.msra.mxu0 %v3237_v7  ;;  %v3243_v57 = vld [vmem:[%s4236_s6 + $0xc8] sm:$0xff]   ;;  %v3260_v7 = vld [vmem:[%s4236_s6 + $0xb0] sm:$0xff]  }
 0x279   : > { %2949 = vmatprep.subr.bf16.mxu0 %v3238_v9  ;;  %3125 = vmatpush3.bf16.msra.mxu1 %v3259_v30  ;;  %v3263_v9 = vld [vmem:[%s4236_s6 + $0xb8] sm:$0xff]  }
 0x27a   : > { %3378 = vpow2.f32 %v622_v59  ;;  %3126 = vmatprep.subr.bf16.mxu1 %v3408_v5 }
 0x27b   : > { %3380 = vpow2.f32 %v620_v60 }
 0x27c   : > { %2950 = vmatpush3.bf16.msra.mxu0 %v3239_v11 }
 0x27d   : > { %2957 = vmatprep.subr.bf16.mxu0 %v3240_v18  ;;  %3127 = vmatpush3.bf16.msra.mxu1 %v3262_v39 }
 0x284   : > { %v3379_v61 = vpop.eup %3378 }
 0x285   : > { %v3381_v62 = vpop.eup %3380  ;;  %v625_v63 = vadd.f32 1.0, %v3379_v61  ;;  %v3245_v61 = vld [vmem:[%s4236_s6 + $0x88] sm:$0xff]  }
 0x286   : > { %v624_v0 = vadd.f32 1.0, %v3381_v62 }
 0x287   : > { %v627_v1 = vmul.f32 %v625_v63, %v625_v63  ;;  %v3246_v63 = vld [vmem:[%s4236_s6 + $0xd0] sm:$0xff]  }
 0x288   : > { %v626_v2 = vmul.f32 %v624_v0, %v624_v0  ;;  %v3248_v0 = vld [vmem:[%s4236_s6 + $0x90] sm:$0xff]  }
 0x289   : > { %v633_v3 = vadd.f32 1.0, %v627_v1  ;;  %v2735_v8 = vadd.f32 -1.0, %v627_v1  ;;  %v3249_v1 = vld [vmem:[%s4236_s6 + $0xd8] sm:$0xff]  }
 0x28a   : > { %v632_v4 = vadd.f32 1.0, %v626_v2  ;;  %v2734_v10 = vadd.f32 -1.0, %v626_v2  ;;  %v3251_v2 = vld [vmem:[%s4236_s6 + $0x98] sm:$0xff]  }
 0x28b   : > { %3382 = vrcp.f32 %v633_v3  ;;  %v631_v12 = vmul.f32 %v2735_v8, %v617_v55  ;;  %v3252_v3 = vld [vmem:[%s4236_s6 + $0xe0] sm:$0xff]   ;;  %v3261_v8 = vld [vmem:[%s4236_s6 + $0xf8] sm:$0xff]  }
 0x28c   : > { %3384 = vrcp.f32 %v632_v4  ;;  %v630_v14 = vmul.f32 %v2734_v10, %v616_v56  ;;  %v3254_v4 = vld [vmem:[%s4236_s6 + $0xa0] sm:$0xff]  }
 0x295   : > { %v3383_v13 = vpop.eup %3382 }
 0x296   : > { %v3385_v15 = vpop.eup %3384  ;;  %v637_v16 = vmul.f32 %v3383_v13, %v631_v12 }
 0x297   : > { %v636_v17 = vmul.f32 %v3385_v15, %v630_v14 }
 0x298   : > { %648 = vrot.lane.b32.xlu0 %v637_v16, %s3410_s22 }
 0x299   : > { %646 = vrot.lane.b32.xlu1 %v636_v17, %s3410_s22 }
 0x30a   : > { %v649_v26 = vpop.permute.xlu0 %648 }
 0x30b   : > { %v654_v27 = vsel %vm484_vm1, %v649_v26, 0.0  ;;  %v647_v29 = vpop.permute.xlu1 %646 }
 0x30c   : > { %v659_v31 = vrot.slane %v654_v27, 7  ;;  %v650_v32 = vsel %vm484_vm1, %v647_v29, %v649_v26  ;;  %v653_v33 = vsel %vm484_vm1, 0.0, %v647_v29 }
 0x30d   : > { %v657_v37 = vrot.slane %v653_v33, 7  ;;  %v658_v38 = vrot.slane %v650_v32, 7  ;;  %v3785_v32 = vld [vmem:[%s4235_s5] sm:$0x3f] }
 0x30e   : > { %666 = vst.msk [vmem:[#allocation2 + $0x10] sm:$0xfe] %vm665_vm6, %v659_v31 }
 0x30f   : > { %670 = vst.msk [vmem:[#allocation2 + $0x28] sm:$0x1] %vm669_vm7, %v659_v31  ;;  %663 = vst [vmem:[#allocation2] sm:$0xfe] %v657_v37 }
 0x310   : > { %664 = vst [vmem:[#allocation2 + $0x8] sm:$0xfe] %v658_v38  ;;  %667 = vst [vmem:[#allocation2 + $0x18] sm:$0x1] %v657_v37 }
 0x311   : > { %668 = vst [vmem:[#allocation2 + $0x20] sm:$0x1] %v658_v38 }
 0x315   : > { %v676_v40 = vld [vmem:[#allocation2 + $0x10] sm:$0xfe] }
 0x316   : > { %v679_v41 = vld [vmem:[#allocation2 + $0x28] sm:$0x1]  ;;  %v693_v44 = vrot.slane %v676_v40, 1  ;;  %v671_v46 = vld [vmem:[#allocation2] sm:$0xff]  ;;  %v673_v14 = vld [vmem:[#allocation2 + $0x10] sm:$0xff] }
 0x317   : > { %v672_v43 = vld [vmem:[#allocation2 + $0x8] sm:$0xff]  ;;  %v694_v45 = vrot.slane %v679_v41, 1  ;;  %v674_v47 = vld [vmem:[#allocation2] sm:$0xfe]  ;;  %v708_v49 = vpack.c.bf16 %v671_v46, %v671_v46  ;;  %v677_v51 = vld [vmem:[#allocation2 + $0x18] sm:$0x1] }
 0x318   : > { %v709_v48 = vpack.c.bf16 %v672_v43, %v672_v43  ;;  %v675_v50 = vld [vmem:[#allocation2 + $0x8] sm:$0xfe]  ;;  %v678_v52 = vld [vmem:[#allocation2 + $0x20] sm:$0x1]  ;;  %v687_v54 = vrot.slane %v674_v47, 1  ;;  %v688_v55 = vrot.slane %v677_v51, 1 }
 0x319   : > { %v695_v53 = vsel %vm686_vm8, %v693_v44, %v694_v45  ;;  %v690_v56 = vrot.slane %v675_v50, 1  ;;  %v691_v58 = vrot.slane %v678_v52, 1  ;;  %v1169_v44 = vrot.slane %v3785_v32, %v3651_v36  ;;  %v3265_v36 = vld [vmem:[%s4237_s7] sm:$0xff]  }
 0x31a   : > { %1065 = vmatprep.mubr.bf16.mxu0 %v709_v48  ;;  %700 = vrot.lane.b32.xlu0 %v695_v53, %s3411_s23  ;;  %v689_v59 = vsel %vm686_vm8, %v687_v54, %v688_v55 }
 0x31b   : > { %1066 = vmatmul.mubr.bf16.vlgmr.msra.gmra.mrb[4].mxu0 %v708_v49  ;;  %v692_v60 = vsel %vm686_vm8, %v690_v56, %v691_v58  ;;  %v3270_v58 = vld [vmem:[%s4237_s7 + $0xc0] sm:$0xff]  }
 0x31c   : > { %2958 = vmatpush3.bf16.msra.mxu0 %v3242_v42  ;;  %v3194_v62 = vpack.i.bf16 %v692_v60, %v689_v59  ;;  %v1164_v42 = vrot.slane %v3785_v32, %v3648_v35  ;;  %v3264_v35 = vld [vmem:[%s4237_s7 + $0x40] sm:$0xff]   ;;  %v3267_v60 = vld [vmem:[%s4237_s7 + $0x8] sm:$0xff]   ;;  %3010 = vmatprep.subr.bf16.mxu1 %v3270_v58  ;;  %v3297_v58 = vld [vmem:[%s4237_s7 + $0xf8] sm:$0xff]  }
 0x31d   : > { %2959 = vmatprep.subr.bf16.mxu0 %v3243_v57  ;;  %v3266_v57 = vld [vmem:[%s4237_s7 + $0x48] sm:$0xff]   ;;  %v3271_v59 = vld [vmem:[%s4237_s7 + $0x80] sm:$0xff]  }
 0x31e   : > { %3195 = vrot.lane.b32.xlu1 %v3194_v62, %s3411_s23  ;;  %v3268_v62 = vld [vmem:[%s4237_s7 + $0x50] sm:$0xff]  }
 0x320   : > { %2960 = vmatpush3.bf16.msra.mxu0 %v3245_v61  ;;  %v3274_v61 = vld [vmem:[%s4237_s7 + $0xc8] sm:$0xff]  }
 0x321   : > { %2961 = vmatprep.subr.bf16.mxu0 %v3246_v63  ;;  %v3275_v63 = vld [vmem:[%s4237_s7 + $0x88] sm:$0xff]  }
 0x324   : > { %2962 = vmatpush3.bf16.msra.mxu0 %v3248_v0  ;;  %v3278_v0 = vld [vmem:[%s4237_s7 + $0xd0] sm:$0xff]  }
 0x325   : > { %2963 = vmatprep.subr.bf16.mxu0 %v3249_v1  ;;  %v3269_v1 = vld [vmem:[%s4237_s7 + $0x10] sm:$0xff]  }
 0x328   : > { %2964 = vmatpush3.bf16.msra.mxu0 %v3251_v2  ;;  %v3272_v2 = vld [vmem:[%s4237_s7 + $0x58] sm:$0xff]  }
 0x329   : > { %2965 = vmatprep.subr.bf16.mxu0 %v3252_v3  ;;  %v3279_v3 = vld [vmem:[%s4237_s7 + $0x90] sm:$0xff]  }
 0x32c   : > { %2966 = vmatpush3.bf16.msra.mxu0 %v3254_v4  ;;  %v3282_v4 = vld [vmem:[%s4237_s7 + $0xd8] sm:$0xff]  }
 0x32d   : > { %2967 = vmatprep.subr.bf16.mxu0 %v3255_v25  ;;  %v3273_v25 = vld [vmem:[%s4237_s7 + $0x18] sm:$0xff]  }
 0x330   : > { %2968 = vmatpush3.bf16.msra.mxu0 %v3257_v28  ;;  %v3276_v28 = vld [vmem:[%s4237_s7 + $0x60] sm:$0xff]  }
 0x331   : > { %2969 = vmatprep.subr.bf16.mxu0 %v3258_v6  ;;  %v3283_v6 = vld [vmem:[%s4237_s7 + $0x98] sm:$0xff]  }
 0x334   : > { %2970 = vmatpush3.bf16.msra.mxu0 %v3260_v7  ;;  %v3286_v7 = vld [vmem:[%s4237_s7 + $0xe0] sm:$0xff]  }
 0x335   : > { %2971 = vmatprep.subr.bf16.mxu0 %v3261_v8  ;;  %v3277_v8 = vld [vmem:[%s4237_s7 + $0x20] sm:$0xff]  }
 0x338   : > { %2972 = vmatpush3.bf16.msra.mxu0 %v3263_v9  ;;  %v3280_v9 = vld [vmem:[%s4237_s7 + $0x68] sm:$0xff]  }
 0x339   : > { %2988 = vmatprep.subr.bf16.mxu0 %v3264_v35 }
 0x38c   : > { %v701_v13 = vpop.permute.xlu0 %700 }
 0x390   : > { %v3196_v10 = vpop.permute.xlu1 %3195 }
 0x391   : > { %v3198_v11 = vunpack.i.h.bf16 %v3196_v10  ;;  %v3197_v12 = vunpack.i.l.bf16 %v3196_v10  ;;  %v3287_v10 = vld [vmem:[%s4237_s7 + $0xa0] sm:$0xff]  }
 0x393   : > { %v703_v15 = vsel %vm575_vm3, %v3198_v11, %v701_v13  ;;  %v707_v16 = vsel %vm575_vm3, %v673_v14, %v3197_v12  ;;  %v702_v17 = vsel %vm575_vm3, %v3197_v12, %v3198_v11  ;;  %v3281_v11 = vld [vmem:[%s4237_s7 + $0x28] sm:$0xff]   ;;  %v3284_v12 = vld [vmem:[%s4237_s7 + $0x70] sm:$0xff]   ;;  %v3288_v14 = vld [vmem:[%s4237_s7 + $0x78] sm:$0xff]  }
 0x394   : > { %v712_v18 = vpack.c.bf16 %v703_v15, %v703_v15  ;;  %v710_v19 = vpack.c.bf16 %v707_v16, %v707_v16  ;;  %v711_v20 = vpack.c.bf16 %v702_v17, %v702_v17  ;;  %v3285_v13 = vld [vmem:[%s4237_s7 + $0x30] sm:$0xff]  }
 0x396   : > { %1105 = vmatprep.mubr.bf16.mxu0 %v711_v20  ;;  %3129 = vmatmul.mubr.bf16.vlgmr.msra.gmra.mrb[4].mxu1 %v712_v18  ;;  %v3289_v20 = vld [vmem:[%s4237_s7 + $0x38] sm:$0xff]  }
 0x397   : > { %1106 = vmatmul.mubr.bf16.vlgmr.msra.gmra.mrb[8].mxu0 %v710_v19  ;;  %3011 = vmatpush3.bf16.msra.mxu1 %v3271_v59  ;;  %v3299_v59 = vld [vmem:[%s4237_s7 + $0xb8] sm:$0xff]  }
 0x398   : > { %2989 = vmatpush3.bf16.msra.mxu0 %v3265_v36  ;;  %3012 = vmatprep.subr.bf16.mxu1 %v3274_v61 }
 0x399   : > { %2990 = vmatprep.subr.bf16.mxu0 %v3266_v57  ;;  %v1215_v57 = vld [vmem:[#allocation2 + $0x28] sm:$0x1] }
 0x39b   : > { %3013 = vmatpush3.bf16.msra.mxu1 %v3275_v63 }
 0x39c   : > { %2991 = vmatpush3.bf16.msra.mxu0 %v3267_v60  ;;  %3014 = vmatprep.subr.bf16.mxu1 %v3278_v0 }
 0x39d   : > { %2992 = vmatprep.subr.bf16.mxu0 %v3268_v62 }
 0x39f   : > { %3015 = vmatpush3.bf16.msra.mxu1 %v3279_v3 }
 0x3a0   : > { %2993 = vmatpush3.bf16.msra.mxu0 %v3269_v1  ;;  %3016 = vmatprep.subr.bf16.mxu1 %v3282_v4 }
 0x3a1   : > { %2994 = vmatprep.subr.bf16.mxu0 %v3272_v2  ;;  %v1264_v2 = vrot.slane %v1215_v57, 1 }
 0x3a3   : > { %3017 = vmatpush3.bf16.msra.mxu1 %v3283_v6 }
 0x3a4   : > { %2995 = vmatpush3.bf16.msra.mxu0 %v3273_v25  ;;  %3018 = vmatprep.subr.bf16.mxu1 %v3286_v7 }
 0x3a5   : > { %2996 = vmatprep.subr.bf16.mxu0 %v3276_v28 }
 0x3a7   : > { %3019 = vmatpush3.bf16.msra.mxu1 %v3287_v10 }
 0x3a8   : > { %2997 = vmatpush3.bf16.msra.mxu0 %v3277_v8 }
 0x3a9   : > { %2998 = vmatprep.subr.bf16.mxu0 %v3280_v9  ;;  %v3294_v9 = vld [vmem:[%s4237_s7 + $0x100] sm:$0xff]  }
 0x3ac   : > { %2999 = vmatpush3.bf16.msra.mxu0 %v3281_v11  ;;  %v3296_v11 = vld [vmem:[%s4237_s7 + $0x148] sm:$0xff]  }
 0x3ad   : > { %3000 = vmatprep.subr.bf16.mxu0 %v3284_v12 }
 0x3b0   : > { %3001 = vmatpush3.bf16.msra.mxu0 %v3285_v13 }
 0x3b1   : > { %3002 = vmatprep.subr.bf16.mxu0 %v3288_v14 }
 0x3b4   : > { %3003 = vmatpush3.bf16.msra.mxu0 %v3289_v20 }
 0x3ee   : > { %v2951_v21 = vpop.f32.mrb[4].mxu0 }
 0x3ef   : > { %v2952_v22 = vpop.f32.mrb[5].mxu0 }
 0x3f0   : > { %v2953_v23 = vadd.f32 %v2952_v22, %v2951_v21  ;;  %v2954_v24 = vpop.f32.mrb[6].mxu0  ;;  %v3290_v21 = vld [vmem:[%s4237_s7 + $0xe8] sm:$0xff]  }
 0x3f1   : > { %v2955_v26 = vpop.f32.mrb[7].mxu0  ;;  %v3291_v22 = vld [vmem:[%s4237_s7 + $0xa8] sm:$0xff]   ;;  %3020 = vmatprep.subr.bf16.mxu1 %v3290_v21  ;;  %v1210_v24 = vld [vmem:[#allocation2] sm:$0xfe] }
 0x3f2   : > { %3021 = vmatpush3.bf16.msra.mxu1 %v3291_v22  ;;  %v1213_v26 = vld [vmem:[#allocation2 + $0x18] sm:$0x1] }
 0x469   : > { %v1147_v27 = vpop.f32.mrb[4].mxu1 }
 0x46a   : > { %v2973_v29 = vpop.f32.mrb[8].mxu0  ;;  %v3130_v30 = vpop.f32.mrb[5].mxu1 }
 0x46b   : > { %v2974_v31 = vpop.f32.mrb[9].mxu0  ;;  %v1150_v33 = vpop.f32.mrb[6].mxu1  ;;  %v1211_v30 = vld [vmem:[#allocation2 + $0x8] sm:$0xfe] }
 0x46c   : > { %v2975_v37 = vadd.f32 %v2974_v31, %v2973_v29  ;;  %v2976_v38 = vpop.f32.mrb[10].mxu0  ;;  %v3131_v39 = vpop.f32.mrb[7].mxu1  ;;  %v3295_v29 = vld [vmem:[%s4237_s7 + $0xb0] sm:$0xff]   ;;  %v1214_v31 = vld [vmem:[#allocation2 + $0x20] sm:$0x1]  ;;  %v1257_v33 = vrot.slane %v1210_v24, 1 }
 0x46d   : > { %v2977_v40 = vpop.f32.mrb[11].mxu0 }
 0x46e   : > { %v1108_v41 = vadd.f32 %v2975_v37, %v2953_v23  ;;  %v3292_v23 = vld [vmem:[%s4237_s7 + $0x140] sm:$0xff]   ;;  %v1258_v37 = vrot.slane %v1213_v26, 1 }
 0x46f   : > { %3032 = vmatprep.subr.bf16.mxu0 %v3292_v23 }
 0x470   : > { %v1148_v43 = vadd.f32 %v1147_v27, %v1108_v41  ;;  %v3293_v27 = vld [vmem:[%s4237_s7 + $0xf0] sm:$0xff]   ;;  %v1259_v0 = vsel %vm686_vm8, %v1257_v33, %v1258_v37  ;;  %v3302_v33 = vld [vmem:[%s4237_s7 + $0x180] sm:$0xff]   ;;  %v3303_v37 = vld [vmem:[%s4237_s7 + $0x158] sm:$0xff]  }
 0x471   : > { %3022 = vmatprep.subr.bf16.mxu1 %v3293_v27 }
 0x472   : > { %v1165_v45 = vmul.f32 %v1164_v42, %v1148_v43  ;;  %3023 = vmatpush3.bf16.msra.mxu1 %v3295_v29  ;;  %v3301_v29 = vld [vmem:[%s4237_s7 + $0x110] sm:$0xff]  }
 0x473   : > { %3024 = vmatprep.subr.bf16.mxu1 %v3297_v58 }
 0x474   : > { %v1170_v46 = vadd.f32 %v1169_v44, %v1165_v45  ;;  %v1212_v45 = vld [vmem:[#allocation2 + $0x10] sm:$0xfe] }
 0x475   : > { %v1263_v62 = vrot.slane %v1212_v45, 1  ;;  %v3309_v45 = vld [vmem:[%s4237_s7 + $0x128] sm:$0xff]  }
 0x476   : > { %v1171_v47 = vmin.f32 %v1170_v46, 20.0  ;;  %3025 = vmatpush3.bf16.msra.mxu1 %v3299_v59 }
 0x477   : > { %3132 = vmatprep.subr.bf16.mxu1 %v3408_v5  ;;  %v1265_v4 = vsel %vm686_vm8, %v1263_v62, %v1264_v2 }
 0x478   : > { %v1172_v48 = vmul.f32 1.442695, %v1171_v47 }
 0x47a   : > { %3386 = vpow2.f32 %v1172_v48 }
 0x484   : > { %v3387_v49 = vpop.eup %3386 }
 0x485   : > { %v1174_v50 = vadd.f32 1.0, %v3387_v49 }
 0x487   : > { %v1175_v51 = vmul.f32 %v1174_v50, %v1174_v50  ;;  %v1260_v50 = vrot.slane %v1211_v30, 1 }
 0x489   : > { %v1178_v52 = vadd.f32 1.0, %v1175_v51  ;;  %v2776_v53 = vadd.f32 -1.0, %v1175_v51 }
 0x48b   : > { %3388 = vrcp.f32 %v1178_v52  ;;  %v1177_v54 = vmul.f32 %v2776_v53, %v1170_v46 }
 0x495   : > { %v3389_v55 = vpop.eup %3388 }
 0x496   : > { %v1180_v56 = vmul.f32 %v3389_v55, %v1177_v54  ;;  %v1261_v55 = vrot.slane %v1214_v31, 1 }
 0x498   : > { %1182 = vrot.lane.b32.xlu1 %v1180_v56, %s3412_s18  ;;  %v1262_v1 = vsel %vm686_vm8, %v1260_v50, %v1261_v55 }
 0x499   : > { %v3204_v3 = vpack.i.bf16 %v1262_v1, %v1259_v0  ;;  %v1853_v1 = vsub.s32 2, %v3645_v34 }
 0x50a   : > { %v1183_v15 = vpop.permute.xlu1 %1182 }
 0x50b   : > { %v1186_v16 = vsel %vm1185_vm9, 0.0, %v1183_v15  ;;  %v1187_v17 = vsel %vm1185_vm9, %v1183_v15, 0.0 }
 0x50c   : > { %v1190_v18 = vrot.slane %v1186_v16, 7  ;;  %v1191_v19 = vrot.slane %v1187_v17, 7  ;;  %v3298_v16 = vld [vmem:[%s4237_s7 + $0x108] sm:$0xff]  }
 0x50e   : > { %1194 = vst [vmem:[#allocation3] sm:$0xfe] %v1190_v18  ;;  %1196 = vst.msk [vmem:[#allocation3 + $0x8] sm:$0xfe] %vm1195_vm10, %v1191_v19 }
 0x50f   : > { %1197 = vst [vmem:[#allocation3 + $0x10] sm:$0x1] %v1190_v18  ;;  %1199 = vst.msk [vmem:[#allocation3 + $0x18] sm:$0x1] %vm1198_vm11, %v1191_v19  ;;  %v3300_v18 = vld [vmem:[%s4237_s7 + $0x150] sm:$0xff]  }
 0x515   : > { %v1202_v38 = vld [vmem:[#allocation3] sm:$0xfe]  ;;  %v1207_v43 = vld [vmem:[#allocation3 + $0x8] sm:$0xfc] }
 0x516   : > { %v1204_v39 = vld [vmem:[#allocation3 + $0x10] sm:$0x1]  ;;  %v1206_v40 = vld [vmem:[#allocation3] sm:$0xfc]  ;;  %v1220_v41 = vrot.slane %v1202_v38, 1  ;;  %v1241_v49 = vrot.slane %v1207_v43, 2 }
 0x517   : > { %v1221_v42 = vrot.slane %v1204_v39, 1  ;;  %v1208_v44 = vld [vmem:[#allocation3 + $0x10] sm:$0x3]  ;;  %v1209_v46 = vld [vmem:[#allocation3 + $0x18] sm:$0x3]  ;;  %v1238_v47 = vrot.slane %v1206_v40, 2 }
 0x518   : > { %v1239_v48 = vrot.slane %v1208_v44, 2  ;;  %v1242_v52 = vrot.slane %v1209_v46, 2  ;;  %v1203_v53 = vld [vmem:[#allocation3 + $0x8] sm:$0xfe]  ;;  %v1205_v54 = vld [vmem:[#allocation3 + $0x18] sm:$0x1] }
 0x519   : > { %v1222_v51 = vsel %vm686_vm8, %v1220_v41, %v1221_v42  ;;  %v1223_v35 = vrot.slane %v1203_v53, 1  ;;  %v1224_v36 = vrot.slane %v1205_v54, 1  ;;  %v1201_v25 = vld [vmem:[#allocation3 + $0x8] sm:$0xff]  ;;  %v1200_v6 = vld [vmem:[#allocation3] sm:$0xff]  ;;  %v3305_v40 = vld [vmem:[%s4237_s7 + $0x188] sm:$0xff]  }
 0x51a   : > { %1226 = vrot.lane.b32.xlu0 %v1222_v51, %s3410_s22  ;;  %v1240_v56 = vsel %vm1237_vm12, %v1238_v47, %v1239_v48  ;;  %v1243_v60 = vsel %vm1237_vm12, %v1241_v49, %v1242_v52  ;;  %v1281_v10 = vpack.c.bf16 %v1200_v6, %v1200_v6  ;;  %v3304_v39 = vld [vmem:[%s4237_s7 + $0x118] sm:$0xff]   ;;  %v3306_v41 = vld [vmem:[%s4237_s7 + $0x160] sm:$0xff]   ;;  %v3308_v43 = vld [vmem:[%s4237_s7 + $0x168] sm:$0xff]  }
 0x51b   : > { %v3199_v61 = vpack.i.bf16 %v1243_v60, %v1240_v56  ;;  %v1225_v63 = vsel %vm686_vm8, %v1223_v35, %v1224_v36  ;;  %v3307_v42 = vld [vmem:[%s4237_s7 + $0x120] sm:$0xff]   ;;  %v3311_v46 = vld [vmem:[%s4237_s7 + $0x130] sm:$0xff]   ;;  %v3312_v47 = vld [vmem:[%s4237_s7 + $0x178] sm:$0xff]  }
 0x51c   : > { %v3313_v48 = vld [vmem:[%s4237_s7 + $0x138] sm:$0xff]  }
 0x51d   : > { %3200 = vrot.lane.b32.xlu1 %v3199_v61, %s3411_s23 }
 0x51e   : > { %1228 = vrot.lane.b32.xlu0 %v1225_v63, %s3410_s22 }
 0x521   : > { %3205 = vrot.lane.b32.xlu1 %v3204_v3, %s3409_s21 }
 0x522   : > { %1270 = vrot.lane.b32.xlu0 %v1265_v4, %s3409_s21 }
 0x58c   : > { %v1227_v28 = vpop.permute.xlu0 %1226 }
 0x58d   : > { %v1278_v7 = vsel %vm484_vm1, %v1201_v25, %v1227_v28  ;;  %v1858_v25 = vsub.s32 3, %v3645_v34 }
 0x58e   : > { %v1282_v8 = vpack.c.bf16 %v1278_v7, %v1278_v7  ;;  %v1854_v7 = vrot.slane %v3785_v32, %v1853_v1 }
 0x58f   : > { %v3201_v12 = vpop.permute.xlu1 %3200 }
 0x590   : > { %1723 = vmatprep.mubr.bf16.mxu0 %v1282_v8  ;;  %v1229_v13 = vpop.permute.xlu0 %1228  ;;  %v3203_v14 = vunpack.i.h.bf16 %v3201_v12  ;;  %v3202_v15 = vunpack.i.l.bf16 %v3201_v12 }
 0x591   : > { %1724 = vmatmul.mubr.bf16.vlgmr.msra.gmra.mrb[12].mxu0 %v1281_v10  ;;  %v1230_v17 = vsel %vm484_vm1, %v1227_v28, %v1229_v13 }
 0x592   : > { %3033 = vmatpush3.bf16.msra.mxu0 %v3294_v9  ;;  %v1248_v23 = vsel %vm575_vm3, %v3202_v15, %v3203_v14  ;;  %v1279_v24 = vsel %vm575_vm3, %v1230_v17, %v3202_v15  ;;  %v1859_v9 = vrot.slane %v3785_v32, %v1858_v25 }
 0x593   : > { %3034 = vmatprep.subr.bf16.mxu0 %v3296_v11  ;;  %v3206_v19 = vpop.permute.xlu1 %3205  ;;  %v1283_v38 = vpack.c.bf16 %v1279_v24, %v1279_v24  ;;  %v3315_v24 = vld [vmem:[%s4238_s8 + $0x88] sm:$0xff]  }
 0x594   : > { %v1271_v20 = vpop.permute.xlu0 %1270  ;;  %v3208_v21 = vunpack.i.h.bf16 %v3206_v19  ;;  %v3207_v22 = vunpack.i.l.bf16 %v3206_v19 }
 0x595   : > { %v1287_v44 = vpack.c.bf16 %v1271_v20, %v1271_v20 }
 0x596   : > { %3035 = vmatpush3.bf16.msra.mxu0 %v3298_v16  ;;  %v1273_v26 = vsel %vm577_vm4, %v3208_v21, %v1271_v20  ;;  %v1280_v27 = vsel %vm577_vm4, %v1248_v23, %v3207_v22  ;;  %v1272_v49 = vsel %vm577_vm4, %v3207_v22, %v3208_v21  ;;  %v3314_v22 = vld [vmem:[%s4238_s8 + $0x80] sm:$0xff]   ;;  %v3413_v23 = vmov 0  }
 0x597   : > { %3036 = vmatprep.subr.bf16.mxu0 %v3300_v18  ;;  %v1286_v30 = vpack.c.bf16 %v1273_v26, %v1273_v26  ;;  %v1284_v31 = vpack.c.bf16 %v1280_v27, %v1280_v27  ;;  %v1285_v50 = vpack.c.bf16 %v1272_v49, %v1272_v49  ;;  %v3320_v26 = vld [vmem:[%s4238_s8 + $0x40] sm:$0xff]   ;;  %v3325_v49 = vld [vmem:[%s4238_s8 + $0xb8] sm:$0xff]  }
 0x598   : > { %v3321_v27 = vld [vmem:[%s4238_s8] sm:$0xff]  }
 0x599   : > { %1763 = vmatprep.mubr.bf16.mxu1 %v1284_v31  ;;  %1803 = vmatprep.mubr.bf16.mxu0 %v1286_v30  ;;  %v3324_v30 = vld [vmem:[%s4238_s8 + $0x8] sm:$0xff]   ;;  %v3316_v31 = vld [vmem:[%s4238_s8 + $0x90] sm:$0xff]  }
 0x59a   : > { %1764 = vmatmul.mubr.bf16.vlgmr.msra.gmra.mrb[8].mxu1 %v1283_v38  ;;  %3037 = vmatpush3.bf16.msra.mxu0 %v3301_v29  ;;  %v3323_v29 = vld [vmem:[%s4238_s8 + $0x48] sm:$0xff]   ;;  %v3317_v38 = vld [vmem:[%s4238_s8 + $0x98] sm:$0xff]  }
 0x59b   : > { %3133 = vmatpush3.bf16.msra.mxu1 %v3302_v33  ;;  %3038 = vmatprep.subr.bf16.mxu0 %v3303_v37  ;;  %v3326_v33 = vld [vmem:[%s4238_s8 + $0x50] sm:$0xff]  }
 0x59c   : > { %3134 = vmatprep.subr.bf16.mxu1 %v3408_v5  ;;  %3136 = vmatprep.mubr.msk.bf16.mxu1 %vm3407_vm0, %v3408_v5  ;;  %v3310_v5 = vld [vmem:[%s4237_s7 + $0x170] sm:$0xff]  }
 0x59d   : > { %v3327_v37 = vld [vmem:[%s4238_s8 + $0x10] sm:$0xff]  }
 0x59e   : > { %3039 = vmatpush3.bf16.msra.mxu0 %v3304_v39  ;;  %v3329_v39 = vld [vmem:[%s4238_s8 + $0x58] sm:$0xff]  }
 0x59f   : > { %3135 = vmatpush3.bf16.msra.mxu1 %v3305_v40  ;;  %3040 = vmatprep.subr.bf16.mxu0 %v3306_v41  ;;  %v3330_v40 = vld [vmem:[%s4238_s8 + $0x18] sm:$0xff]   ;;  %v3318_v41 = vld [vmem:[%s4238_s8 + $0xa0] sm:$0xff]  }
 0x5a0   : > { %3057 = vmatprep.subr.bf16.mxu1 %v3320_v26 }
 0x5a2   : > { %3041 = vmatpush3.bf16.msra.mxu0 %v3307_v42  ;;  %3137 = vmatmul.mubr.msk.bf16.vlgmr.msra.gmra.mrb[12].mxu1 %vm484_vm1, %v1287_v44  ;;  %v3332_v42 = vld [vmem:[%s4238_s8 + $0x60] sm:$0xff]   ;;  %v3319_v44 = vld [vmem:[%s4238_s8 + $0xa8] sm:$0xff]  }
 0x5a3   : > { %3042 = vmatprep.subr.bf16.mxu0 %v3308_v43  ;;  %3058 = vmatpush3.bf16.msra.mxu1 %v3321_v27  ;;  %v3333_v43 = vld [vmem:[%s4238_s8 + $0x20] sm:$0xff]  }
 0x5a4   : > { %3059 = vmatprep.subr.bf16.mxu1 %v3323_v29 }
 0x5a6   : > { %3043 = vmatpush3.bf16.msra.mxu0 %v3309_v45  ;;  %v3335_v45 = vld [vmem:[%s4238_s8 + $0x68] sm:$0xff]  }
 0x5a7   : > { %3044 = vmatprep.subr.bf16.mxu0 %v3310_v5  ;;  %3060 = vmatpush3.bf16.msra.mxu1 %v3324_v30  ;;  %v3336_v5 = vld [vmem:[%s4238_s8 + $0x28] sm:$0xff]  }
 0x5a8   : > { %3061 = vmatprep.subr.bf16.mxu1 %v3326_v33 }
 0x5aa   : > { %3045 = vmatpush3.bf16.msra.mxu0 %v3311_v46  ;;  %v3322_v46 = vld [vmem:[%s4238_s8 + $0xb0] sm:$0xff]  }
 0x5ab   : > { %3046 = vmatprep.subr.bf16.mxu0 %v3312_v47  ;;  %3062 = vmatpush3.bf16.msra.mxu1 %v3327_v37  ;;  %v3338_v47 = vld [vmem:[%s4238_s8 + $0x70] sm:$0xff]  }
 0x5ac   : > { %3063 = vmatprep.subr.bf16.mxu1 %v3329_v39 }
 0x5ae   : > { %3047 = vmatpush3.bf16.msra.mxu0 %v3313_v48  ;;  %v3339_v48 = vld [vmem:[%s4238_s8 + $0x30] sm:$0xff]  }
 0x5af   : > { %2220 = vmatprep.subr.bf16.mxu0 %v3413_v23  ;;  %3064 = vmatpush3.bf16.msra.mxu1 %v3330_v40 }
 0x5b0   : > { %3065 = vmatprep.subr.bf16.mxu1 %v3332_v42  ;;  %v2262_v42 = vsub.s32 4, %v3645_v34 }
 0x5b1   : > { %1804 = vmatmul.mubr.bf16.vlgmr.msra.gmra.mrb[16].mxu0 %v1285_v50  ;;  %v3328_v50 = vld [vmem:[%s4238_s8 + $0xc0] sm:$0xff]  }
 0x5b2   : > { %2221 = vmatpush1.bf16.msra.mxu0 %v3314_v22 }
 0x5b3   : > { %2222 = vmatprep.subr.bf16.mxu0 %v3413_v23  ;;  %3066 = vmatpush3.bf16.msra.mxu1 %v3333_v43 }
 0x5b4   : > { %3067 = vmatprep.subr.bf16.mxu1 %v3335_v45  ;;  %v2267_v45 = vsub.s32 5, %v3645_v34 }
 0x5b6   : > { %2223 = vmatpush1.bf16.msra.mxu0 %v3315_v24 }
 0x5b7   : > { %2224 = vmatprep.subr.bf16.mxu0 %v3413_v23  ;;  %3068 = vmatpush3.bf16.msra.mxu1 %v3336_v5 }
 0x5b8   : > { %3069 = vmatprep.subr.bf16.mxu1 %v3338_v47 }
 0x5ba   : > { %2225 = vmatpush1.bf16.msra.mxu0 %v3316_v31 }
 0x5bb   : > { %2226 = vmatprep.subr.bf16.mxu0 %v3413_v23  ;;  %3070 = vmatpush3.bf16.msra.mxu1 %v3339_v48  ;;  %v2263_v48 = vrot.slane %v3785_v32, %v2262_v42 }
 0x5be   : > { %2227 = vmatpush1.bf16.msra.mxu0 %v3317_v38 }
 0x5bf   : > { %2228 = vmatprep.subr.bf16.mxu0 %v3413_v23 }
 0x5c2   : > { %2229 = vmatpush1.bf16.msra.mxu0 %v3318_v41 }
 0x5c3   : > { %2230 = vmatprep.subr.bf16.mxu0 %v3413_v23 }
 0x5c6   : > { %2231 = vmatpush1.bf16.msra.mxu0 %v3319_v44 }
 0x5c7   : > { %2232 = vmatprep.subr.bf16.mxu0 %v3413_v23 }
 0x5ca   : > { %2233 = vmatpush1.bf16.msra.mxu0 %v3322_v46 }
 0x5cb   : > { %2234 = vmatprep.subr.bf16.mxu0 %v3413_v23 }
 0x5ce   : > { %2235 = vmatpush1.bf16.msra.mxu0 %v3325_v49 }
 0x5cf   : > { %2236 = vmatprep.subr.bf16.mxu0 %v3413_v23 }
 0x5d2   : > { %2237 = vmatpush1.bf16.msra.mxu0 %v3328_v50 }
 0x5d3   : > { %2238 = vmatprep.subr.bf16.mxu0 %v3413_v23 }
 0x664   : > { %v3004_v51 = vpop.f32.mrb[12].mxu0 }
 0x665   : > { %v3005_v52 = vpop.f32.mrb[13].mxu0 }
 0x666   : > { %v3006_v53 = vadd.f32 %v3005_v52, %v3004_v51  ;;  %v3007_v54 = vpop.f32.mrb[14].mxu0  ;;  %v3331_v51 = vld [vmem:[%s4238_s8 + $0xc8] sm:$0xff]   ;;  %v3334_v52 = vld [vmem:[%s4238_s8 + $0xd0] sm:$0xff]  }
 0x667   : > { %v3008_v55 = vpop.f32.mrb[15].mxu0  ;;  %2239 = vmatpush1.bf16.msra.mxu0 %v3331_v51  ;;  %v3340_v54 = vld [vmem:[%s4238_s8 + $0xe0] sm:$0xff]  }
 0x668   : > { %2240 = vmatprep.subr.bf16.mxu0 %v3413_v23 }
 0x66b   : > { %2241 = vmatpush1.bf16.msra.mxu0 %v3334_v52 }
 0x66c   : > { %2242 = vmatprep.subr.bf16.mxu0 %v3413_v23 }
 0x66d   : > { %v3026_v56 = vpop.f32.mrb[8].mxu1 }
 0x66e   : > { %v3027_v35 = vpop.f32.mrb[9].mxu1 }
 0x66f   : > { %v3028_v36 = vadd.f32 %v3027_v35, %v3026_v56  ;;  %v3029_v57 = vpop.f32.mrb[10].mxu1 }
 0x670   : > { %v3030_v58 = vpop.f32.mrb[11].mxu1 }
 0x671   : > { %v1766_v59 = vadd.f32 %v3028_v36, %v3006_v53  ;;  %v3337_v53 = vld [vmem:[%s4238_s8 + $0xd8] sm:$0xff]  }
 0x672   : > { %2243 = vmatpush1.bf16.msra.mxu0 %v3337_v53  ;;  %v3341_v58 = vld [vmem:[%s4238_s8 + $0x78] sm:$0xff]  }
 0x673   : > { %2244 = vmatprep.subr.bf16.mxu0 %v3413_v23  ;;  %3071 = vmatprep.subr.bf16.mxu1 %v3341_v58 }
 0x675   : > { %v1845_v60 = vpop.f32.mrb[12].mxu1 }
 0x676   : > { %v3138_v61 = vpop.f32.mrb[13].mxu1  ;;  %2245 = vmatpush1.bf16.msra.mxu0 %v3340_v54  ;;  %v2268_v54 = vrot.slane %v3785_v32, %v2267_v45  ;;  %v3344_v32 = vld [vmem:[%s4239_s9 + $0x40] sm:$0xff]  }
 0x677   : > { %v1848_v62 = vpop.f32.mrb[14].mxu1  ;;  %2246 = vmatprep.subr.bf16.mxu0 %v3413_v23 }
 0x678   : > { %v3139_v63 = vpop.f32.mrb[15].mxu1 }
 0x684   : > { %v3048_v0 = vpop.f32.mrb[16].mxu0 }
 0x685   : > { %v3049_v2 = vpop.f32.mrb[17].mxu0 }
 0x686   : > { %v3050_v3 = vadd.f32 %v3049_v2, %v3048_v0  ;;  %v3051_v4 = vpop.f32.mrb[18].mxu0 }
 0x687   : > { %v3052_v28 = vpop.f32.mrb[19].mxu0 }
 0x688   : > { %v1806_v6 = vadd.f32 %v3050_v3, %v1766_v59  ;;  %v3342_v59 = vld [vmem:[%s4238_s8 + $0x38] sm:$0xff]  }
 0x689   : > { %3072 = vmatpush3.bf16.msra.mxu1 %v3342_v59 }
 0x68a   : > { %v3973_v8 = vadd.f32 %v1845_v60, %v1806_v6  ;;  %v3343_v60 = vld [vmem:[%s4238_s8 + $0xe8] sm:$0xff]   ;;  %3079 = vmatprep.subr.bf16.mxu1 %v3344_v32 }
 0x68b   : > { %2247 = vmatpush1.bf16.msra.mxu0 %v3343_v60  ;;  %v3369_v32 = vld [vmem:[%s4239_s9 + $0xc8] sm:$0xff]  }
 0x68c   : > { %v1855_v10 = vmul.f32 %v1854_v7, %v3973_v8 }
 0x68e   : > { %v1860_v11 = vadd.f32 %v1859_v9, %v1855_v10 }
 0x690   : > { %v1861_v12 = vmin.f32 %v1860_v11, 20.0 }
 0x692   : > { %v1862_v13 = vmul.f32 1.442695, %v1861_v12 }
 0x694   : > { %3390 = vpow2.f32 %v1862_v13 }
 0x69e   : > { %v3391_v14 = vpop.eup %3390 }
 0x69f   : > { %v1864_v15 = vadd.f32 1.0, %v3391_v14 }
 0x6a1   : > { %v1865_v16 = vmul.f32 %v1864_v15, %v1864_v15 }
 0x6a3   : > { %v1868_v17 = vadd.f32 1.0, %v1865_v16  ;;  %v2828_v18 = vadd.f32 -1.0, %v1865_v16 }
 0x6a5   : > { %3392 = vrcp.f32 %v1868_v17  ;;  %v1867_v19 = vmul.f32 %v2828_v18, %v1860_v11 }
 0x6af   : > { %v3393_v20 = vpop.eup %3392 }
 0x6b0   : > { %v1870_v21 = vmul.f32 %v3393_v20, %v1867_v19 }
 0x6b2   : > { %1872 = vrot.lane.b32.xlu1 %v1870_v21, %s3412_s18 }
 0x724   : > { %v1873_v55 = vpop.permute.xlu1 %1872 }
 0x725   : > { %v1875_v56 = vsel %vm1185_vm9, 0.0, %v1873_v55  ;;  %v1876_v35 = vsel %vm1185_vm9, %v1873_v55, 0.0 }
 0x726   : > { %v1879_v36 = vrot.slane %v1875_v56, 7  ;;  %v1880_v57 = vrot.slane %v1876_v35, 7 }
 0x728   : > { %1883 = vst [vmem:[#allocation3] sm:$0xfe] %v1879_v36  ;;  %1884 = vst.msk [vmem:[#allocation3 + $0x8] sm:$0xfe] %vm1195_vm10, %v1880_v57 }
 0x729   : > { %1885 = vst [vmem:[#allocation3 + $0x10] sm:$0x1] %v1879_v36  ;;  %1886 = vst.msk [vmem:[#allocation3 + $0x18] sm:$0x1] %vm1198_vm11, %v1880_v57 }
 0x72f   : > { %v1893_v61 = vld [vmem:[#allocation3] sm:$0xfc]  ;;  %v1894_v62 = vld [vmem:[#allocation3 + $0x8] sm:$0xfc] }
 0x730   : > { %v1895_v63 = vld [vmem:[#allocation3 + $0x10] sm:$0x3]  ;;  %v1896_v0 = vld [vmem:[#allocation3 + $0x18] sm:$0x3]  ;;  %v1918_v1 = vrot.slane %v1893_v61, 2  ;;  %v1921_v3 = vrot.slane %v1894_v62, 2 }
 0x731   : > { %v1919_v2 = vrot.slane %v1895_v63, 2  ;;  %v1922_v4 = vrot.slane %v1896_v0, 2  ;;  %v1889_v25 = vld [vmem:[#allocation3] sm:$0xfe]  ;;  %v1890_v28 = vld [vmem:[#allocation3 + $0x8] sm:$0xfe] }
 0x732   : > { %v1891_v7 = vld [vmem:[#allocation3 + $0x10] sm:$0x1]  ;;  %v1892_v9 = vld [vmem:[#allocation3 + $0x18] sm:$0x1]  ;;  %v1901_v10 = vrot.slane %v1889_v25, 1  ;;  %v1904_v11 = vrot.slane %v1890_v28, 1 }
 0x733   : > { %v1920_v6 = vsel %vm1237_vm12, %v1918_v1, %v1919_v2  ;;  %v1923_v12 = vsel %vm1237_vm12, %v1921_v3, %v1922_v4  ;;  %v1902_v13 = vrot.slane %v1891_v7, 1  ;;  %v1905_v14 = vrot.slane %v1892_v9, 1  ;;  %v1888_v30 = vld [vmem:[#allocation3 + $0x8] sm:$0xff]  ;;  %v1887_v31 = vld [vmem:[#allocation3] sm:$0xff]  ;;  %v3345_v0 = vld [vmem:[%s4239_s9] sm:$0xff]  }
 0x734   : > { %v3214_v15 = vpack.i.bf16 %v1923_v12, %v1920_v6  ;;  %v1933_v40 = vpack.c.bf16 %v1887_v31, %v1887_v31  ;;  %v3346_v1 = vld [vmem:[%s4239_s9 + $0x48] sm:$0xff]   ;;  %v3348_v3 = vld [vmem:[%s4239_s9 + $0x50] sm:$0xff]   ;;  %v3350_v25 = vld [vmem:[%s4239_s9 + $0x58] sm:$0xff]  }
 0x735   : > { %v1903_v16 = vsel %vm686_vm8, %v1901_v10, %v1902_v13  ;;  %v1906_v17 = vsel %vm686_vm8, %v1904_v11, %v1905_v14  ;;  %v3347_v2 = vld [vmem:[%s4239_s9 + $0x8] sm:$0xff]   ;;  %v3349_v4 = vld [vmem:[%s4239_s9 + $0x10] sm:$0xff]   ;;  %v3351_v28 = vld [vmem:[%s4239_s9 + $0x18] sm:$0xff]  }
 0x736   : > { %3215 = vrot.lane.b32.xlu1 %v3214_v15, %s3411_s23  ;;  %v3209_v18 = vpack.i.bf16 %v1906_v17, %v1903_v16  ;;  %v3352_v6 = vld [vmem:[%s4239_s9 + $0x60] sm:$0xff]   ;;  %v3354_v9 = vld [vmem:[%s4239_s9 + $0x68] sm:$0xff]   ;;  %v3356_v11 = vld [vmem:[%s4239_s9 + $0x70] sm:$0xff]  }
 0x737   : > { %v3353_v7 = vld [vmem:[%s4239_s9 + $0x20] sm:$0xff]   ;;  %v3355_v10 = vld [vmem:[%s4239_s9 + $0x28] sm:$0xff]   ;;  %v3357_v12 = vld [vmem:[%s4239_s9 + $0x30] sm:$0xff]  }
 0x738   : > { %3210 = vrot.lane.b32.xlu0 %v3209_v18, %s3410_s22  ;;  %v3358_v13 = vld [vmem:[%s4239_s9 + $0x78] sm:$0xff]  }
 0x7a8   : > { %v3216_v19 = vpop.permute.xlu1 %3215 }
 0x7a9   : > { %v3218_v20 = vunpack.i.h.bf16 %v3216_v19  ;;  %v3217_v21 = vunpack.i.l.bf16 %v3216_v19  ;;  %v3359_v19 = vld [vmem:[%s4239_s9 + $0x38] sm:$0xff]  }
 0x7aa   : > { %v3211_v22 = vpop.permute.xlu0 %3210 }
 0x7ab   : > { %v1928_v24 = vsel %vm575_vm3, %v3217_v21, %v3218_v20  ;;  %v3213_v26 = vunpack.i.h.bf16 %v3211_v22  ;;  %v3212_v27 = vunpack.i.l.bf16 %v3211_v22 }
 0x7ac   : > { %v1936_v29 = vpack.c.bf16 %v1928_v24, %v1928_v24 }
 0x7ad   : > { %v1911_v33 = vsel %vm484_vm1, %v3212_v27, %v3213_v26  ;;  %v1931_v37 = vsel %vm484_vm1, %v1888_v30, %v3212_v27 }
 0x7ae   : > { %v1934_v38 = vpack.c.bf16 %v1931_v37, %v1931_v37  ;;  %2859 = vmatprep.mubr.msk.bf16.mxu0 %vm577_vm4, %v1936_v29  ;;  %v1932_v39 = vsel %vm575_vm3, %v1911_v33, %v3217_v21 }
 0x7af   : > { %v1935_v41 = vpack.c.bf16 %v1932_v39, %v1932_v39 }
 0x7b0   : > { %2212 = vmatprep.mubr.bf16.mxu1 %v1934_v38 }
 0x7b1   : > { %2213 = vmatmul.mubr.bf16.vlgmr.msra.gmra.mrb[16].mxu1 %v1933_v40  ;;  %2253 = vmatmul.mubr.bf16.vlgmr.msra.gmra.mrb[20].mxu0 %v1935_v41 }
 0x7b2   : > { %3080 = vmatpush3.bf16.msra.mxu1 %v3345_v0  ;;  %v3370_v0 = vld [vmem:[%s4239_s9 + $0xd0] sm:$0xff]  }
 0x7b3   : > { %3081 = vmatprep.subr.bf16.mxu1 %v3346_v1  ;;  %v3371_v1 = vld [vmem:[%s4239_s9 + $0xd8] sm:$0xff]  }
 0x7b6   : > { %3082 = vmatpush3.bf16.msra.mxu1 %v3347_v2  ;;  %v3372_v2 = vld [vmem:[%s4239_s9 + $0xe0] sm:$0xff]  }
 0x7b7   : > { %3083 = vmatprep.subr.bf16.mxu1 %v3348_v3 }
 0x7ba   : > { %3084 = vmatpush3.bf16.msra.mxu1 %v3349_v4  ;;  %v3373_v4 = vld [vmem:[%s4239_s9 + $0xe8] sm:$0xff]  }
 0x7bb   : > { %3085 = vmatprep.subr.bf16.mxu1 %v3350_v25 }
 0x7be   : > { %3086 = vmatpush3.bf16.msra.mxu1 %v3351_v28 }
 0x7bf   : > { %3087 = vmatprep.subr.bf16.mxu1 %v3352_v6 }
 0x7c2   : > { %3088 = vmatpush3.bf16.msra.mxu1 %v3353_v7 }
 0x7c3   : > { %3089 = vmatprep.subr.bf16.mxu1 %v3354_v9 }
 0x7c6   : > { %3090 = vmatpush3.bf16.msra.mxu1 %v3355_v10 }
 0x7c7   : > { %3091 = vmatprep.subr.bf16.mxu1 %v3356_v11 }
 0x7ca   : > { %3092 = vmatpush3.bf16.msra.mxu1 %v3357_v12 }
 0x7cb   : > { %3093 = vmatprep.subr.bf16.mxu1 %v3358_v13 }
 0x7ce   : > { %3094 = vmatpush3.bf16.msra.mxu1 %v3359_v19 }
 0x7cf   : > { %2629 = vmatprep.subr.bf16.mxu1 %v3413_v23 }
 0x884   : > { %v3073_v43 = vpop.f32.mrb[16].mxu1  ;;  %v2254_v44 = vpop.f32.mrb[20].mxu0 }
 0x885   : > { %v3074_v5 = vpop.f32.mrb[17].mxu1  ;;  %v2256_v46 = vpop.f32.mrb[21].mxu0 }
 0x886   : > { %v3075_v47 = vadd.f32 %v3074_v5, %v3073_v43  ;;  %v3076_v49 = vpop.f32.mrb[18].mxu1  ;;  %v2257_v50 = vpop.f32.mrb[22].mxu0 }
 0x887   : > { %v3077_v51 = vpop.f32.mrb[19].mxu1  ;;  %v2258_v52 = vpop.f32.mrb[23].mxu0 }
 0x888   : > { %v2255_v53 = vadd.f32 %v3075_v47, %v2254_v44  ;;  %v3360_v52 = vld [vmem:[%s4239_s9 + $0x80] sm:$0xff]  }
 0x88a   : > { %v2264_v55 = vmul.f32 %v2263_v48, %v2255_v53 }
 0x88c   : > { %v2269_v56 = vadd.f32 %v2268_v54, %v2264_v55 }
 0x88e   : > { %v2270_v35 = vmin.f32 %v2269_v56, 20.0 }
 0x890   : > { %v2271_v36 = vmul.f32 1.442695, %v2270_v35  ;;  %v3361_v35 = vld [vmem:[%s4239_s9 + $0x88] sm:$0xff]  }
 0x892   : > { %3394 = vpow2.f32 %v2271_v36 }
 0x89c   : > { %v3395_v57 = vpop.eup %3394 }
 0x89d   : > { %v2273_v58 = vadd.f32 1.0, %v3395_v57 }
 0x89f   : > { %v2274_v34 = vmul.f32 %v2273_v58, %v2273_v58  ;;  %v3362_v58 = vld [vmem:[%s4239_s9 + $0x90] sm:$0xff]  }
 0x8a1   : > { %v2277_v59 = vadd.f32 1.0, %v2274_v34  ;;  %v2860_v60 = vadd.f32 -1.0, %v2274_v34  ;;  %v3363_v34 = vld [vmem:[%s4239_s9 + $0x98] sm:$0xff]  }
 0x8a3   : > { %3396 = vrcp.f32 %v2277_v59  ;;  %v2276_v61 = vmul.f32 %v2860_v60, %v2269_v56  ;;  %v3364_v59 = vld [vmem:[%s4239_s9 + $0xa0] sm:$0xff]   ;;  %v3365_v60 = vld [vmem:[%s4239_s9 + $0xa8] sm:$0xff]  }
 0x8ad   : > { %v3397_v62 = vpop.eup %3396 }
 0x8ae   : > { %v2279_v63 = vmul.f32 %v3397_v62, %v2276_v61  ;;  %v3366_v61 = vld [vmem:[%s4239_s9 + $0xb0] sm:$0xff]   ;;  %v3367_v62 = vld [vmem:[%s4239_s9 + $0xb8] sm:$0xff]  }
 0x8b0   : > { %2281 = vrot.lane.b32.xlu0 %v2279_v63, %s3412_s18  ;;  %v3368_v63 = vld [vmem:[%s4239_s9 + $0xc0] sm:$0xff]   ;;  %s2731_s18 = sshll.u32 %s4242_s14, 3 }
 0x8b1   : > { %s357_s30 = scalar_lea.vmem %s4240_s10, %s2731_s18 }
 0x922   : > { %v2282_v14 = vpop.permute.xlu0 %2281 }
 0x923   : > { %v2284_v15 = vsel %vm1185_vm9, 0.0, %v2282_v14  ;;  %v2285_v16 = vsel %vm1185_vm9, %v2282_v14, 0.0 }
 0x924   : > { %v2288_v17 = vrot.slane %v2284_v15, 7  ;;  %v2289_v18 = vrot.slane %v2285_v16, 7 }
 0x926   : > { %2292 = vst [vmem:[#allocation3] sm:$0xfe] %v2288_v17  ;;  %2294 = vst [vmem:[#allocation3 + $0x10] sm:$0x1] %v2288_v17 }
 0x927   : > { %2295 = vst.msk [vmem:[#allocation3 + $0x18] sm:$0x1] %vm1198_vm11, %v2289_v18 }
 0x928   : > { %2293 = vst.msk [vmem:[#allocation3 + $0x8] sm:$0xfe] %vm1195_vm10, %v2289_v18 }
 0x92d   : > { %v2298_v22 = vld [vmem:[#allocation3] sm:$0xfe]  ;;  %v2300_v27 = vld [vmem:[#allocation3 + $0x10] sm:$0x1] }
 0x92e   : > { %v2301_v21 = vld [vmem:[#allocation3 + $0x18] sm:$0x1]  ;;  %v2310_v29 = vrot.slane %v2298_v22, 1  ;;  %v2311_v30 = vrot.slane %v2300_v27, 1  ;;  %v2302_v31 = vld [vmem:[#allocation3] sm:$0xfc] }
 0x92f   : > { %v2299_v20 = vld [vmem:[#allocation3 + $0x8] sm:$0xfe]  ;;  %v2314_v26 = vrot.slane %v2301_v21, 1  ;;  %v2304_v38 = vld [vmem:[#allocation3 + $0x10] sm:$0x3]  ;;  %v2327_v40 = vrot.slane %v2302_v31, 2 }
 0x930   : > { %v2313_v24 = vrot.slane %v2299_v20, 1  ;;  %v2303_v33 = vld [vmem:[#allocation3 + $0x8] sm:$0xfc]  ;;  %v2305_v39 = vld [vmem:[#allocation3 + $0x18] sm:$0x3]  ;;  %v2312_v42 = vsel %vm686_vm8, %v2310_v29, %v2311_v30  ;;  %v2328_v43 = vrot.slane %v2304_v38, 2 }
 0x931   : > { %v2330_v41 = vrot.slane %v2303_v33, 2  ;;  %v2331_v44 = vrot.slane %v2305_v39, 2  ;;  %2316 = vrot.lane.b32.xlu1 %v2312_v42, %s3410_s22  ;;  %v2297_v47 = vld [vmem:[#allocation3 + $0x8] sm:$0xff]  ;;  %v2296_v49 = vld [vmem:[#allocation3] sm:$0xff] }
 0x932   : > { %v2315_v37 = vsel %vm686_vm8, %v2313_v24, %v2314_v26  ;;  %v2329_v45 = vsel %vm1237_vm12, %v2327_v40, %v2328_v43  ;;  %v2342_v53 = vpack.c.bf16 %v2296_v49, %v2296_v49 }
 0x933   : > { %2318 = vrot.lane.b32.xlu0 %v2315_v37, %s3410_s22  ;;  %v2332_v5 = vsel %vm1237_vm12, %v2330_v41, %v2331_v44 }
 0x934   : > { %v3219_v46 = vpack.i.bf16 %v2332_v5, %v2329_v45 }
 0x936   : > { %3220 = vrot.lane.b32.xlu1 %v3219_v46, %s3411_s23 }
 0x9a3   : > { %v2317_v48 = vpop.permute.xlu1 %2316 }
 0x9a4   : > { %v2340_v50 = vsel %vm484_vm1, %v2297_v47, %v2317_v48 }
 0x9a5   : > { %v2343_v51 = vpack.c.bf16 %v2340_v50, %v2340_v50  ;;  %v2319_v3 = vpop.permute.xlu0 %2318 }
 0x9a6   : > { %v2320_v25 = vsel %vm484_vm1, %v2317_v48, %v2319_v3 }
 0x9a7   : > { %2621 = vmatprep.mubr.bf16.mxu1 %v2343_v51 }
 0x9a8   : > { %v3221_v54 = vpop.permute.xlu1 %3220  ;;  %2622 = vmatmul.mubr.bf16.vlgmr.msra.gmra.mrb[20].mxu1 %v2342_v53 }
 0x9a9   : > { %v3223_v55 = vunpack.i.h.bf16 %v3221_v54  ;;  %v3222_v56 = vunpack.i.l.bf16 %v3221_v54  ;;  %2630 = vmatpush1.bf16.msra.mxu1 %v3360_v52 }
 0x9aa   : > { %2631 = vmatprep.subr.bf16.mxu1 %v3413_v23 }
 0x9ab   : > { %v2337_v36 = vsel %vm575_vm3, %v3222_v56, %v3223_v55  ;;  %v2341_v28 = vsel %vm575_vm3, %v2320_v25, %v3222_v56 }
 0x9ac   : > { %v2345_v57 = vpack.c.bf16 %v2337_v36, %v2337_v36  ;;  %v2344_v6 = vpack.c.bf16 %v2341_v28, %v2341_v28 }
 0x9ad   : > { %2632 = vmatpush1.bf16.msra.mxu1 %v3361_v35 }
 0x9ae   : > { %2891 = vmatprep.mubr.msk.bf16.mxu1 %vm577_vm4, %v2345_v57  ;;  %2633 = vmatprep.subr.bf16.mxu1 %v3413_v23 }
 0x9b1   : > { %2634 = vmatpush1.bf16.msra.mxu1 %v3362_v58 }
 0x9b2   : > { %2635 = vmatprep.subr.bf16.mxu1 %v3413_v23 }
 0x9b5   : > { %2636 = vmatpush1.bf16.msra.mxu1 %v3363_v34 }
 0x9b6   : > { %2637 = vmatprep.subr.bf16.mxu1 %v3413_v23 }
 0x9b9   : > { %2638 = vmatpush1.bf16.msra.mxu1 %v3364_v59 }
 0x9ba   : > { %2639 = vmatprep.subr.bf16.mxu1 %v3413_v23 }
 0x9bd   : > { %2640 = vmatpush1.bf16.msra.mxu1 %v3365_v60 }
 0x9be   : > { %2641 = vmatprep.subr.bf16.mxu1 %v3413_v23 }
 0x9c1   : > { %2642 = vmatpush1.bf16.msra.mxu1 %v3366_v61 }
 0x9c2   : > { %2643 = vmatprep.subr.bf16.mxu1 %v3413_v23 }
 0x9c5   : > { %2644 = vmatpush1.bf16.msra.mxu1 %v3367_v62 }
 0x9c6   : > { %2645 = vmatprep.subr.bf16.mxu1 %v3413_v23 }
 0x9c9   : > { %2646 = vmatpush1.bf16.msra.mxu1 %v3368_v63 }
 0x9ca   : > { %2647 = vmatprep.subr.bf16.mxu1 %v3413_v23 }
 0x9cd   : > { %2648 = vmatpush1.bf16.msra.mxu1 %v3369_v32 }
 0x9ce   : > { %2649 = vmatprep.subr.bf16.mxu1 %v3413_v23 }
 0x9d1   : > { %2650 = vmatpush1.bf16.msra.mxu1 %v3370_v0 }
 0x9d2   : > { %2651 = vmatprep.subr.bf16.mxu1 %v3413_v23 }
 0x9d5   : > { %2652 = vmatpush1.bf16.msra.mxu1 %v3371_v1 }
 0x9d6   : > { %2653 = vmatprep.subr.bf16.mxu1 %v3413_v23 }
 0x9d9   : > { %2654 = vmatpush1.bf16.msra.mxu1 %v3372_v2 }
 0x9da   : > { %2655 = vmatprep.subr.bf16.mxu1 %v3413_v23 }
 0x9dd   : > { %2656 = vmatpush1.bf16.msra.mxu1 %v3373_v4 }
 0x9e0   : > { %2662 = vmatmul.mubr.bf16.vlgmr.msra.gmra.mrb[24].mxu1 %v2344_v6 }
 0xa7b   : > { %v3095_v7 = vpop.f32.mrb[20].mxu1 }
 0xa7c   : > { %v3096_v9 = vpop.f32.mrb[21].mxu1 }
 0xa7d   : > { %v3097_v10 = vadd.f32 %v3096_v9, %v3095_v7  ;;  %v3098_v11 = vpop.f32.mrb[22].mxu1 }
 0xa7e   : > { %v3099_v12 = vpop.f32.mrb[23].mxu1 }
 0xab3   : > { %v2663_v13 = vpop.f32.mrb[24].mxu1 }
 0xab4   : > { %v2664_v14 = vadd.f32 %v3097_v10, %v2663_v13  ;;  %v2665_v15 = vpop.f32.mrb[25].mxu1 }
 0xab5   : > { %v2666_v16 = vpop.f32.mrb[26].mxu1 }
 0xab6   : > { %v2669_v23 = vadd.f32 %v2664_v14, %v3973_v8  ;;  %v2667_v17 = vpop.f32.mrb[27].mxu1 }
 0xab8   : > { %2670 = vst [vmem:[%s357_s30] sm:$0xff] %v2669_v23 }
 0xab9 PF: > { %s20_s13 = sadd.s32 1, %s3404_s13  }
 0xaba   : > { %p17_p4 = scmp.ge.s32.totalorder %s20_s13, 4  }
 0xabc   :  { %19 = sbr.rel (!%p17_p4) target bundleno = 1 (0x1), region = 92 }

</bundles_post_ra>
